<compile_context>
chip_gen: v5e
topology: v5e:2x2
jax: 0.10.0
libtpu: 0.0.40
codegen_flags: <defaults>
</compile_context>

<pallas_src>
import functools

import jax
import jax.numpy as jnp
from jax.experimental import pallas as pl
from jax.experimental.pallas import tpu as pltpu

LATENT_DIM = 32
HIDDEN = 360
HIDDEN_PAD = 384          # 3 * 128  (lane-dense)
OUT = 28 * 28             # 784
OUT_PAD = 896             # 7 * 128  (lane-dense)


def _cdiv(a, b):
    return -(-a // b)


def _round_up(x, m):
    return ((x + m - 1) // m) * m


def _choose_tiles(B, tb):
    """Balanced batch tiling.

    - >= 2 grid steps whenever B > 8, so the batch axis can shard across both
      v7x TensorCores (harmless on single-TC v5e/v6e).
    - tile size is round_up(ceil(B / n_tiles), 8): a near-divisor of B, so the
      tail tile is never mostly dead rows.
    """
    n_tiles = max(_cdiv(B, tb), 1)
    if B > 8:
        n_tiles = max(n_tiles, 2)
    tb_eff = _round_up(_cdiv(B, n_tiles), 8)
    n_tiles = max(_cdiv(B, tb_eff), 2 if B > 8 else 1)
    b_pad = n_tiles * tb_eff
    return tb_eff, n_tiles, b_pad


def decoder_kernel(z_ref, w1_ref, b1_ref, w2_ref, b2_ref, w3_ref, b3_ref, o_ref):
    # Layer 1: Linear(latent -> 384) + ReLU   (bf16 MXU matmul, f32 accumulation)
    z = z_ref[...].astype(jnp.bfloat16)
    h1 = jnp.dot(z, w1_ref[...], preferred_element_type=jnp.float32)
    h1 = jnp.maximum(h1 + b1_ref[...], 0.0).astype(jnp.bfloat16)

    # Layer 2: Linear(384 -> 384) + ReLU
    h2 = jnp.dot(h1, w2_ref[...], preferred_element_type=jnp.float32)
    h2 = jnp.maximum(h2 + b2_ref[...], 0.0).astype(jnp.bfloat16)

    # Layer 3: Linear(384 -> 896) + Sigmoid   (padded lanes sliced off in wrapper)
    logits = jnp.dot(h2, w3_ref[...], preferred_element_type=jnp.float32)
    x = logits + b3_ref[...]
    # sigmoid(x) == 0.5 * (tanh(0.5 x) + 1): single EUP transcendental.
    o_ref[...] = (0.5 * (jnp.tanh(0.5 * x) + 1.0)).astype(jnp.bfloat16)


@functools.partial(jax.jit, static_argnames=("tb",))
def decoder_forward(z, params, *, tb=512):
    """z: (B, latent_dim) f32 -> (B, 1, 28, 28) f32.

    tb: max batch tile (default 512 -- amortizes per-grid-step overhead and the
    MXU RHS weight push; per-step VMEM footprint stays well under every
    generation's limit).
    """
    w1, b1, w2, b2, w3, b3 = params
    B, L = z.shape
    H = w1.shape[1]            # 384
    O = w3.shape[1]            # 896

    tb_eff, n_tiles, b_pad = _choose_tiles(B, tb)
    if b_pad != B:
        z = jnp.pad(z, ((0, b_pad - B), (0, 0)))

    full = lambda i: (0, 0)    # weights/biases resident across all grid steps

    flat = pl.pallas_call(
        decoder_kernel,
        out_shape=jax.ShapeDtypeStruct((b_pad, O), jnp.bfloat16),
        grid=(n_tiles,),
        in_specs=[
            pl.BlockSpec((tb_eff, L), lambda i: (i, 0)),   # z tile
            pl.BlockSpec((L, H), full),                    # w1
            pl.BlockSpec((1, H), full),                    # b1
            pl.BlockSpec((H, H), full),                    # w2
            pl.BlockSpec((1, H), full),                    # b2
            pl.BlockSpec((H, O), full),                    # w3
            pl.BlockSpec((1, O), full),                    # b3
        ],
        out_specs=pl.BlockSpec((tb_eff, O), lambda i: (i, 0)),
        compiler_params=pltpu.CompilerParams(
            dimension_semantics=("parallel",),             # megacore on v7x
            # Explicit headroom for big tiles (v5e default scoped VMEM = 16 MiB).
            vmem_limit_bytes=(32 * 1024 * 1024) if tb_eff >= 512 else None,
        ),
    )(z, w1, b1, w2, b2, w3, b3)

    # Drop batch/lane padding, return f32, match torch's .view(-1, 1, 28, 28).
    return flat[:B, :OUT].astype(jnp.float32).reshape(-1, 1, 28, 28)


def init_params(key, latent_dim):
    """Deterministic synthetic parameters mimicking torch.nn.Linear init.

    Logical shapes: Linear(latent, 360), Linear(360, 360), Linear(360, 784).
    Stored transposed as (in, out), zero-padded to lane-dense (384 / 896) and
    with weights cast to bf16 (biases stay f32)."""
    dims = [(latent_dim, HIDDEN), (HIDDEN, HIDDEN), (HIDDEN, OUT)]
    pads = [(latent_dim, HIDDEN_PAD), (HIDDEN_PAD, HIDDEN_PAD), (HIDDEN_PAD, OUT_PAD)]
    params = []
    for (fan_in, fan_out), (pin, pout) in zip(dims, pads):
        key, kw, kb = jax.random.split(key, 3)
        bound = 1.0 / jnp.sqrt(fan_in)  # torch.nn.Linear default uniform range
        w = jax.random.uniform(kw, (fan_in, fan_out), jnp.float32, -bound, bound)
        b = jax.random.uniform(kb, (1, fan_out), jnp.float32, -bound, bound)
        w = jnp.pad(w, ((0, pin - fan_in), (0, pout - fan_out)))   # zero-pad
        b = jnp.pad(b, ((0, 0), (0, pout - fan_out)))
        params.extend([w.astype(jnp.bfloat16), b])
    return tuple(params)


def reference_forward(z, params):
    """Pure-JAX f32 reference using the same (bf16) weights."""
    w1, b1, w2, b2, w3, b3 = params
    h = jnp.maximum(z @ w1.astype(jnp.float32) + b1, 0.0)
    h = jnp.maximum(h @ w2.astype(jnp.float32) + b2, 0.0)
    out = jax.nn.sigmoid(h @ w3.astype(jnp.float32) + b3)
    return out[:, :OUT].reshape(-1, 1, 28, 28)


if __name__ == "__main__":
    latent_dim = LATENT_DIM
    batch = 8

    key = jax.random.PRNGKey(0)
    key, kz = jax.random.split(key)
    z = jax.random.normal(kz, (batch, latent_dim), dtype=jnp.float32)
    params = init_params(key, latent_dim)

    out = decoder_forward(z, params)
    out = jax.block_until_ready(out)

    ref = reference_forward(z, params)
    assert out.shape == (batch, 1, 28, 28), out.shape
    # bf16 matmul inputs + bf16 output store (f32 accumulation) -> looser
    # tolerance than pure f32 (bf16 store alone is up to ~4e-3 abs near 1.0).
    assert jnp.allclose(out, ref, atol=1e-2, rtol=2e-2), "mismatch vs reference"

    print("KERNEL_OK")
</pallas_src>

<mosaic_0001>
module attributes {stable_mosaic.version = 11 : i64} {
  func.func @decoder_kernel(%arg0: i32, %arg1: memref<8x32xf32, #tpu.memory_space<vmem>>, %arg2: memref<32x384xbf16, #tpu.memory_space<vmem>>, %arg3: memref<1x384xf32, #tpu.memory_space<vmem>>, %arg4: memref<384x384xbf16, #tpu.memory_space<vmem>>, %arg5: memref<1x384xf32, #tpu.memory_space<vmem>>, %arg6: memref<384x896xbf16, #tpu.memory_space<vmem>>, %arg7: memref<1x896xf32, #tpu.memory_space<vmem>>, %arg8: memref<8x896xbf16, #tpu.memory_space<vmem>>) attributes {dimension_semantics = [#tpu.dimension_semantics<parallel>], iteration_bounds = array<i64: 1>, scalar_prefetch = 0 : i64, scratch_operands = 0 : i64, tpu.core_type = #tpu.core_type<tc>, window_params = [{transform_indices = @transform_0, window_bounds = array<i64: 8, 32>}, {pipeline_mode = #tpu.pipeline_mode<synchronous>, transform_indices = @transform_1, window_bounds = array<i64: 32, 384>}, {pipeline_mode = #tpu.pipeline_mode<synchronous>, transform_indices = @transform_2, window_bounds = array<i64: 1, 384>}, {pipeline_mode = #tpu.pipeline_mode<synchronous>, transform_indices = @transform_3, window_bounds = array<i64: 384, 384>}, {pipeline_mode = #tpu.pipeline_mode<synchronous>, transform_indices = @transform_4, window_bounds = array<i64: 1, 384>}, {pipeline_mode = #tpu.pipeline_mode<synchronous>, transform_indices = @transform_5, window_bounds = array<i64: 384, 896>}, {pipeline_mode = #tpu.pipeline_mode<synchronous>, transform_indices = @transform_6, window_bounds = array<i64: 1, 896>}, {transform_indices = @transform_7, window_bounds = array<i64: 8, 896>}]} {
    %c0 = arith.constant 0 : index
    %c0_0 = arith.constant 0 : index
    %0 = vector.load %arg1[%c0, %c0_0] : memref<8x32xf32, #tpu.memory_space<vmem>>, vector<8x32xf32>
    %1 = arith.truncf %0 : vector<8x32xf32> to vector<8x32xbf16>
    %c0_1 = arith.constant 0 : index
    %c0_2 = arith.constant 0 : index
    %2 = vector.load %arg2[%c0_1, %c0_2] : memref<32x384xbf16, #tpu.memory_space<vmem>>, vector<32x384xbf16>
    %cst = arith.constant dense<0.000000e+00> : vector<8x384xf32>
    %3 = tpu.matmul %1, %2, %cst {dimension_numbers = #tpu.dot_dimension_numbers<[1], [0], [0], [1], [0, 0, 1, 1], [], []>} : vector<8x32xbf16>, vector<32x384xbf16>, vector<8x384xf32> -> vector<8x384xf32>
    %c0_3 = arith.constant 0 : index
    %c0_4 = arith.constant 0 : index
    %4 = vector.load %arg3[%c0_3, %c0_4] : memref<1x384xf32, #tpu.memory_space<vmem>>, vector<1x384xf32>
    %5 = vector.broadcast %4 : vector<1x384xf32> to vector<8x384xf32>
    %6 = arith.addf %3, %5 : vector<8x384xf32>
    %cst_5 = arith.constant 0.000000e+00 : f32
    %7 = vector.broadcast %cst_5 : f32 to vector<8x384xf32>
    %8 = arith.maximumf %6, %7 : vector<8x384xf32>
    %9 = arith.truncf %8 : vector<8x384xf32> to vector<8x384xbf16>
    %c0_6 = arith.constant 0 : index
    %c0_7 = arith.constant 0 : index
    %10 = vector.load %arg4[%c0_6, %c0_7] : memref<384x384xbf16, #tpu.memory_space<vmem>>, vector<384x384xbf16>
    %cst_8 = arith.constant dense<0.000000e+00> : vector<8x384xf32>
    %11 = tpu.matmul %9, %10, %cst_8 {dimension_numbers = #tpu.dot_dimension_numbers<[1], [0], [0], [1], [0, 0, 1, 1], [], []>} : vector<8x384xbf16>, vector<384x384xbf16>, vector<8x384xf32> -> vector<8x384xf32>
    %c0_9 = arith.constant 0 : index
    %c0_10 = arith.constant 0 : index
    %12 = vector.load %arg5[%c0_9, %c0_10] : memref<1x384xf32, #tpu.memory_space<vmem>>, vector<1x384xf32>
    %13 = vector.broadcast %12 : vector<1x384xf32> to vector<8x384xf32>
    %14 = arith.addf %11, %13 : vector<8x384xf32>
    %cst_11 = arith.constant 0.000000e+00 : f32
    %15 = vector.broadcast %cst_11 : f32 to vector<8x384xf32>
    %16 = arith.maximumf %14, %15 : vector<8x384xf32>
    %17 = arith.truncf %16 : vector<8x384xf32> to vector<8x384xbf16>
    %c0_12 = arith.constant 0 : index
    %c0_13 = arith.constant 0 : index
    %18 = vector.load %arg6[%c0_12, %c0_13] : memref<384x896xbf16, #tpu.memory_space<vmem>>, vector<384x896xbf16>
    %cst_14 = arith.constant dense<0.000000e+00> : vector<8x896xf32>
    %19 = tpu.matmul %17, %18, %cst_14 {dimension_numbers = #tpu.dot_dimension_numbers<[1], [0], [0], [1], [0, 0, 1, 1], [], []>} : vector<8x384xbf16>, vector<384x896xbf16>, vector<8x896xf32> -> vector<8x896xf32>
    %c0_15 = arith.constant 0 : index
    %c0_16 = arith.constant 0 : index
    %20 = vector.load %arg7[%c0_15, %c0_16] : memref<1x896xf32, #tpu.memory_space<vmem>>, vector<1x896xf32>
    %21 = vector.broadcast %20 : vector<1x896xf32> to vector<8x896xf32>
    %22 = arith.addf %19, %21 : vector<8x896xf32>
    %cst_17 = arith.constant 5.000000e-01 : f32
    %23 = vector.broadcast %cst_17 : f32 to vector<8x896xf32>
    %24 = arith.mulf %23, %22 : vector<8x896xf32>
    %25 = math.tanh %24 : vector<8x896xf32>
    %cst_18 = arith.constant 1.000000e+00 : f32
    %26 = vector.broadcast %cst_18 : f32 to vector<8x896xf32>
    %27 = arith.addf %25, %26 : vector<8x896xf32>
    %cst_19 = arith.constant 5.000000e-01 : f32
    %28 = vector.broadcast %cst_19 : f32 to vector<8x896xf32>
    %29 = arith.mulf %28, %27 : vector<8x896xf32>
    %30 = arith.truncf %29 : vector<8x896xf32> to vector<8x896xbf16>
    %c0_20 = arith.constant 0 : index
    %c0_21 = arith.constant 0 : index
    %31 = vector.load %arg8[%c0_20, %c0_21] : memref<8x896xbf16, #tpu.memory_space<vmem>>, vector<8x896xbf16>
    tpu.vector_store %arg8[%c0_20, %c0_21], %30 {strides = array<i32>} : memref<8x896xbf16, #tpu.memory_space<vmem>>, vector<8x896xbf16>,
    return
  }
  func.func @transform_0(%arg0: i32) -> (i32, i32) {
    %c0_i32 = arith.constant 0 : i32
    %c0_i32_0 = arith.constant 0 : i32
    return %arg0, %c0_i32 : i32, i32
  }
  func.func @transform_1(%arg0: i32) -> (i32, i32) {
    %c0_i32 = arith.constant 0 : i32
    %c0_i32_0 = arith.constant 0 : i32
    %c0_i32_1 = arith.constant 0 : i32
    return %c0_i32, %c0_i32_0 : i32, i32
  }
  func.func @transform_2(%arg0: i32) -> (i32, i32) {
    %c0_i32 = arith.constant 0 : i32
    %c0_i32_0 = arith.constant 0 : i32
    %c0_i32_1 = arith.constant 0 : i32
    return %c0_i32, %c0_i32_0 : i32, i32
  }
  func.func @transform_3(%arg0: i32) -> (i32, i32) {
    %c0_i32 = arith.constant 0 : i32
    %c0_i32_0 = arith.constant 0 : i32
    %c0_i32_1 = arith.constant 0 : i32
    return %c0_i32, %c0_i32_0 : i32, i32
  }
  func.func @transform_4(%arg0: i32) -> (i32, i32) {
    %c0_i32 = arith.constant 0 : i32
    %c0_i32_0 = arith.constant 0 : i32
    %c0_i32_1 = arith.constant 0 : i32
    return %c0_i32, %c0_i32_0 : i32, i32
  }
  func.func @transform_5(%arg0: i32) -> (i32, i32) {
    %c0_i32 = arith.constant 0 : i32
    %c0_i32_0 = arith.constant 0 : i32
    %c0_i32_1 = arith.constant 0 : i32
    return %c0_i32, %c0_i32_0 : i32, i32
  }
  func.func @transform_6(%arg0: i32) -> (i32, i32) {
    %c0_i32 = arith.constant 0 : i32
    %c0_i32_0 = arith.constant 0 : i32
    %c0_i32_1 = arith.constant 0 : i32
    return %c0_i32, %c0_i32_0 : i32, i32
  }
  func.func @transform_7(%arg0: i32) -> (i32, i32) {
    %c0_i32 = arith.constant 0 : i32
    %c0_i32_0 = arith.constant 0 : i32
    return %arg0, %c0_i32 : i32, i32
  }
}

</mosaic_0001>

<bundles_post_ra>
// kernel: decoder_forward.1
= control target key start
LH: loop header
LB: loop body
LE: loop exit
PB: predicated region body
PF: predicated region fallthrough
CT: control target
= control target key end

     0   :  { %12 = vsyncpa [#allocation3], 0  ;;  %s3760_s0 = inlined_call_operand.hbm [shape: f32[8,32], index: 0, kind: input, shape index: {}]   ;;  %s3761_s1 = inlined_call_operand.hbm [shape: bf16[32,384], index: 1, kind: input, shape index: {}]   ;;  %s3762_s2 = inlined_call_operand.hbm [shape: f32[1,384], index: 2, kind: input, shape index: {}]   ;;  %s3763_s3 = inlined_call_operand.hbm [shape: bf16[384,384], index: 3, kind: input, shape index: {}]   ;;  %s3764_s4 = inlined_call_operand.vmem [shape: f32[1,384], index: 4, kind: input, shape index: {}]   ;;  %s3765_s5 = inlined_call_operand.hbm [shape: bf16[384,896], index: 5, kind: input, shape index: {}]   ;;  %s3766_s6 = inlined_call_operand.hbm [shape: f32[1,896], index: 6, kind: input, shape index: {}]   ;;  %s3767_s7 = inlined_call_operand.vmem [shape: bf16[8,896], index: 7, kind: output, shape index: {}]  }
   0x1   :  { %13 = vsyncpa [#allocation5], 0 }
   0x2   :  { %14 = vsyncpa [#allocation8], 0  ;;  %s31_s26 = sshll.u32 %s3761_s1, 4  ;;  %s32_s26 = int_to_ptr.hbm [resolvable:$true] %s31_s26 }
   0x3   :  { %15 = vsyncpa [#allocation11], 0  ;;  %s3623_s27 = smov [#allocation4]   ;;  %s55_s8 = sshll.u32 %s3763_s3, 4  ;;  %s56_s8 = int_to_ptr.hbm [resolvable:$true] %s55_s8 }
   0x4   :  { %s33_s28 = sshll.u32 %s3623_s27, 4  ;;  %s3624_s9 = smov 192   ;;  %s34_s28 = int_to_ptr.vmem [resolvable:$true] %s33_s28 }
   0x5   :  { %s3625_s10 = smov 12   ;;  %s3626_s11 = smov [#allocation7]  }
   0x6   :  { %39 = dma.hbm_to_vmem [thread:$0]  %s32_s26, 768, %s34_s28, [#allocation5], %s3624_s9, %s3624_s9, %s3625_s10  }
   0x7   :  { %s57_s12 = sshll.u32 %s3626_s11, 4  ;;  %s21_s15 = sshll.u32 %s3760_s0, 4  ;;  %s58_s12 = int_to_ptr.vmem [resolvable:$true] %s57_s12  ;;  %s22_s15 = int_to_ptr.hbm [resolvable:$true] %s21_s15 }
   0x8   :  { %63 = dma.hbm_to_vmem [thread:$0]  %s56_s8, 9216, %s58_s12, [#allocation8], %s3624_s9, %s3624_s9, %s3625_s10  }
   0x9   :  { %s45_s17 = sshll.u32 %s3762_s2, 4  ;;  %s3627_s18 = smov [#allocation2]   ;;  %s46_s17 = int_to_ptr.hbm [resolvable:$true] %s45_s17 }
   0xa   :  { %s23_s19 = sshll.u32 %s3627_s18, 4  ;;  %s3628_s3 = smov [#allocation6]   ;;  %s24_s19 = int_to_ptr.vmem [resolvable:$true] %s23_s19 }
   0xb   :  { %26 = dma.hbm_to_vmem [thread:$0]  %s22_s15, 128, %s24_s19, [#allocation3]  }
   0xc   :  { %s47_s20 = sshll.u32 %s3628_s3, 4  ;;  %s70_s23 = sshll.u32 %s3765_s5, 4  ;;  %s48_s20 = int_to_ptr.vmem [resolvable:$true] %s47_s20  ;;  %s71_s23 = int_to_ptr.hbm [resolvable:$true] %s70_s23 }
   0xd   :  { %50 = dma.hbm_to_vmem [thread:$0]  %s46_s17, 48, %s48_s20, [#allocation5]  }
   0xe   :  { %s3629_s0 = smov [#allocation9]   ;;  %s84_s2 = sshll.u32 %s3766_s6, 4  ;;  %s85_s2 = int_to_ptr.hbm [resolvable:$true] %s84_s2 }
   0xf   :  { %s72_s24 = sshll.u32 %s3629_s0, 4  ;;  %s3630_s27 = smov 448   ;;  %s73_s24 = int_to_ptr.vmem [resolvable:$true] %s72_s24 }
  0x10   :  { %s3631_s28 = smov 28   ;;  %s3632_s29 = smov [#allocation10]  }
  0x11   :  { %78 = dma.hbm_to_vmem [thread:$0]  %s71_s23, 21504, %s73_s24, [#allocation8], %s3630_s27, %s3630_s27, %s3631_s28  }
  0x12   :  { %s86_s30 = sshll.u32 %s3632_s29, 4  ;;  %s87_s30 = int_to_ptr.vmem [resolvable:$true] %s86_s30 }
  0x13   :  { %89 = dma.hbm_to_vmem [thread:$0]  %s85_s2, 112, %s87_s30, [#allocation11]  }
  0x14   :  { %3615 = dma.done.wait [#allocation3], 128  }
  0x15   :  { %3616 = vsyncadd [#allocation3], 4294967168 }
  0x16   :  { %3617 = dma.done.wait [#allocation5], 816  }
  0x17   :  { %3618 = vsyncadd [#allocation5], 4294966480 }
  0x18   :  { %3619 = dma.done.wait [#allocation8], 30720  }
  0x19   :  { %3620 = vsyncadd [#allocation8], 4294936576 }
  0x1a   :  { %3621 = dma.done.wait [#allocation11], 112  }
  0x1b   :  { %3622 = vsyncadd [#allocation11], 4294967184  ;;  %v2228_v0 = vld [vmem:[#allocation4 + $0x18] sm:$0xf]  ;;  %v3205_v1 = vld [vmem:[#allocation4 + $0x20] sm:$0xf0] }
  0x1c   :  { %v2236_v2 = vld [vmem:[#allocation4 + $0x20] sm:$0xf]  ;;  %v2229_v3 = vor.u32 %v3205_v1, %v2228_v0  ;;  %v3206_v4 = vld [vmem:[#allocation4 + $0x28] sm:$0xf0]  ;;  %v2224_v8 = vld [vmem:[#allocation4 + $0x8] sm:$0xf] }
  0x1d   :  { %v2216_v5 = vld [vmem:[#allocation4] sm:$0xf]  ;;  %v3202_v6 = vld [vmem:[#allocation4 + $0x8] sm:$0xf0]  ;;  %v2237_v7 = vor.u32 %v3206_v4, %v2236_v2  ;;  %v3203_v9 = vld [vmem:[#allocation4 + $0x10] sm:$0xf0] }
  0x1e   :  { %175 = vmatpush.bf16.msra.mxu1 %v2229_v3  ;;  %v2217_v10 = vor.u32 %v3202_v6, %v2216_v5  ;;  %v115_v11 = vld [vmem:[#allocation2] sm:$0xff]  ;;  %v2230_v13 = vld [vmem:[#allocation4 + $0x24] sm:$0xf0]  ;;  %v2225_v14 = vor.u32 %v3203_v9, %v2224_v8  ;;  %v3201_v16 = vld [vmem:[#allocation4 + $0x4] sm:$0xf]  ;;  %vm165_vm0 = vcmask 261120  }
  0x1f   :  { %v3204_v12 = vld [vmem:[#allocation4 + $0x1c] sm:$0xf]  ;;  %201 = vmatpush.bf16.msra.mxu2 %v2237_v7  ;;  %v3229_v18 = vld [vmem:[#allocation7 + $0xb0] sm:$0xf0]  ;;  %v2218_v19 = vld [vmem:[#allocation4 + $0xc] sm:$0xf0]  ;;  %v3691_v23 = vpack.c.bf16 %v115_v11, %v115_v11 }
  0x20   :  { %v2233_v15 = vor.u32 %v3204_v12, %v2230_v13  ;;  %v2327_v17 = vld [vmem:[#allocation7 + $0xa8] sm:$0xf]  ;;  %v2315_v21 = vld [vmem:[#allocation7 + $0x90] sm:$0xf]  ;;  %v3226_v22 = vld [vmem:[#allocation7 + $0x98] sm:$0xf0]  ;;  %v2221_v28 = vor.u32 %v3201_v16, %v2218_v19 }
  0x21   :  { %v2328_v20 = vor.u32 %v3229_v18, %v2327_v17  ;;  %v2316_v24 = vor.u32 %v3226_v22, %v2315_v21  ;;  %v2303_v25 = vld [vmem:[#allocation7 + $0x78] sm:$0xf]  ;;  %v3228_v26 = vld [vmem:[#allocation7 + $0xac] sm:$0xf]  ;;  %v3223_v29 = vld [vmem:[#allocation7 + $0x80] sm:$0xf0] }
  0x22   :  { %176 = vmatpush.bf16.msra.mxu1 %v2217_v10  ;;  %v2329_v27 = vld [vmem:[#allocation7 + $0xb4] sm:$0xf0]  ;;  %v3225_v31 = vld [vmem:[#allocation7 + $0x94] sm:$0xf]  ;;  %v2317_v32 = vld [vmem:[#allocation7 + $0x9c] sm:$0xf0]  ;;  %v2304_v38 = vor.u32 %v3223_v29, %v2303_v25 }
  0x23   :  { %702 = vmatpush.bf16.msra.mxu3 %v2328_v20  ;;  %202 = vmatpush.bf16.msra.mxu2 %v2225_v14  ;;  %v2332_v30 = vor.u32 %v3228_v26, %v2329_v27  ;;  %v2519_v33 = vld [vmem:[#allocation7 + $0x228] sm:$0xf]  ;;  %v3277_v34 = vld [vmem:[#allocation7 + $0x230] sm:$0xf0]  ;;  %v2320_v35 = vor.u32 %v3225_v31, %v2317_v32  ;;  %v3222_v37 = vld [vmem:[#allocation7 + $0x7c] sm:$0xf] }
  0x24   :  { %v2520_v36 = vor.u32 %v3277_v34, %v2519_v33  ;;  %v2305_v39 = vld [vmem:[#allocation7 + $0x84] sm:$0xf0]  ;;  %v2507_v40 = vld [vmem:[#allocation7 + $0x210] sm:$0xf]  ;;  %v3274_v41 = vld [vmem:[#allocation7 + $0x218] sm:$0xf0] }
  0x25   :  { %2238 = vmatmul.msk.bf16.vlgmr.msra.gmra.mxu1 %vm165_vm0, %v3691_v23  ;;  %v2291_v42 = vld [vmem:[#allocation7 + $0x60] sm:$0xf]  ;;  %v3220_v43 = vld [vmem:[#allocation7 + $0x68] sm:$0xf0]  ;;  %v2508_v44 = vor.u32 %v3274_v41, %v2507_v40  ;;  %v2495_v45 = vld [vmem:[#allocation7 + $0x1f8] sm:$0xf]  ;;  %v2308_v46 = vor.u32 %v3222_v37, %v2305_v39 }
  0x26   :  { %188 = vmatpush.bf16.msrb.mxu1 %v2233_v15  ;;  %2240 = vmatmul.msk.bf16.vlgmr.msra.gmra.mxu2 %vm165_vm0, %v3691_v23  ;;  %v3271_v47 = vld [vmem:[#allocation7 + $0x200] sm:$0xf0]  ;;  %v2423_v48 = vld [vmem:[#allocation7 + $0x168] sm:$0xf]  ;;  %v3253_v49 = vld [vmem:[#allocation7 + $0x170] sm:$0xf0]  ;;  %v2292_v50 = vor.u32 %v3220_v43, %v2291_v42 }
  0x27   :  { %741 = vmatpush.bf16.msrb.mxu2 %v2332_v30  ;;  %703 = vmatpush.bf16.msra.mxu3 %v2316_v24  ;;  %v3219_v51 = vld [vmem:[#allocation7 + $0x64] sm:$0xf]  ;;  %v2293_v52 = vld [vmem:[#allocation7 + $0x6c] sm:$0xf0]  ;;  %v2424_v53 = vor.u32 %v3253_v49, %v2423_v48  ;;  %v2279_v54 = vld [vmem:[#allocation7 + $0x48] sm:$0xf]  ;;  %v2496_v56 = vor.u32 %v3271_v47, %v2495_v45 }
  0x28   :  { %v3217_v55 = vld [vmem:[#allocation7 + $0x50] sm:$0xf0]  ;;  %v2411_v57 = vld [vmem:[#allocation7 + $0x150] sm:$0xf]  ;;  %v3250_v58 = vld [vmem:[#allocation7 + $0x158] sm:$0xf0]  ;;  %v2296_v59 = vor.u32 %v3219_v51, %v2293_v52 }
  0x29   :  { %715 = vmatpush.bf16.msra.mxu0 %v2424_v53  ;;  %v2483_v60 = vld [vmem:[#allocation7 + $0x1e0] sm:$0xf]  ;;  %v3268_v61 = vld [vmem:[#allocation7 + $0x1e8] sm:$0xf0]  ;;  %v2412_v62 = vor.u32 %v3250_v58, %v2411_v57  ;;  %v2280_v63 = vor.u32 %v3217_v55, %v2279_v54  ;;  %v2281_v1 = vld [vmem:[#allocation7 + $0x54] sm:$0xf0] }
  0x2a   :  { %189 = vmatpush.bf16.msrb.mxu1 %v2221_v28  ;;  %v3216_v0 = vld [vmem:[#allocation7 + $0x4c] sm:$0xf]  ;;  %v2399_v2 = vld [vmem:[#allocation7 + $0x138] sm:$0xf]  ;;  %v2267_v3 = vld [vmem:[#allocation7 + $0x30] sm:$0xf]  ;;  %v2484_v6 = vor.u32 %v3268_v61, %v2483_v60 }
  0x2b   :  { %742 = vmatpush.bf16.msrb.mxu2 %v2320_v35  ;;  %704 = vmatpush.bf16.msra.mxu3 %v2304_v38  ;;  %v3214_v4 = vld [vmem:[#allocation7 + $0x38] sm:$0xf0]  ;;  %v3247_v5 = vld [vmem:[#allocation7 + $0x140] sm:$0xf0]  ;;  %v2471_v7 = vld [vmem:[#allocation7 + $0x1c8] sm:$0xf]  ;;  %v2284_v9 = vor.u32 %v3216_v0, %v2281_v1 }
  0x2c   :  { %v2400_v8 = vor.u32 %v3247_v5, %v2399_v2  ;;  %v3265_v10 = vld [vmem:[#allocation7 + $0x1d0] sm:$0xf0]  ;;  %v2387_v11 = vld [vmem:[#allocation7 + $0x120] sm:$0xf]  ;;  %v3244_v12 = vld [vmem:[#allocation7 + $0x128] sm:$0xf0]  ;;  %v2268_v13 = vor.u32 %v3214_v4, %v2267_v3 }
  0x2d   :  { %716 = vmatpush.bf16.msra.mxu0 %v2412_v62  ;;  %v3213_v14 = vld [vmem:[#allocation7 + $0x34] sm:$0xf]  ;;  %v2269_v15 = vld [vmem:[#allocation7 + $0x3c] sm:$0xf0]  ;;  %v2255_v16 = vld [vmem:[#allocation7 + $0x18] sm:$0xf]  ;;  %v2472_v18 = vor.u32 %v3265_v10, %v2471_v7  ;;  %v2388_v20 = vor.u32 %v3244_v12, %v2387_v11 }
  0x2e   :  { %728 = vmatpush.bf16.msra.mxu1 %v2520_v36  ;;  %v3211_v17 = vld [vmem:[#allocation7 + $0x20] sm:$0xf0]  ;;  %v2459_v19 = vld [vmem:[#allocation7 + $0x1b0] sm:$0xf]  ;;  %v2272_v21 = vor.u32 %v3213_v14, %v2269_v15  ;;  %v3262_v22 = vld [vmem:[#allocation7 + $0x1b8] sm:$0xf0] }
  0x2f   :  { %743 = vmatpush.bf16.msrb.mxu2 %v2308_v46  ;;  %705 = vmatpush.bf16.msra.mxu3 %v2292_v50  ;;  %v2375_v24 = vld [vmem:[#allocation7 + $0x108] sm:$0xf]  ;;  %v3241_v25 = vld [vmem:[#allocation7 + $0x110] sm:$0xf0]  ;;  %v2256_v26 = vor.u32 %v3211_v17, %v2255_v16  ;;  %v3210_v27 = vld [vmem:[#allocation7 + $0x1c] sm:$0xf]  ;;  %v2460_v33 = vor.u32 %v3262_v22, %v2459_v19 }
  0x30   :  { %v2257_v28 = vld [vmem:[#allocation7 + $0x24] sm:$0xf0]  ;;  %v2243_v29 = vld [vmem:[#allocation7] sm:$0xf]  ;;  %v3208_v30 = vld [vmem:[#allocation7 + $0x8] sm:$0xf0]  ;;  %v2376_v35 = vor.u32 %v3241_v25, %v2375_v24 }
  0x31   :  { %717 = vmatpush.bf16.msra.mxu0 %v2400_v8  ;;  %v3252_v31 = vld [vmem:[#allocation7 + $0x16c] sm:$0xf]  ;;  %v2425_v32 = vld [vmem:[#allocation7 + $0x174] sm:$0xf0]  ;;  %v3259_v36 = vld [vmem:[#allocation7 + $0x1a0] sm:$0xf0]  ;;  %v2244_v39 = vor.u32 %v3208_v30, %v2243_v29 }
  0x32   :  { %729 = vmatpush.bf16.msra.mxu1 %v2508_v44  ;;  %v2447_v34 = vld [vmem:[#allocation7 + $0x198] sm:$0xf]  ;;  %v2363_v37 = vld [vmem:[#allocation7 + $0xf0] sm:$0xf]  ;;  %v3238_v38 = vld [vmem:[#allocation7 + $0xf8] sm:$0xf0]  ;;  %v2428_v42 = vor.u32 %v3252_v31, %v2425_v32 }
  0x33   :  { %744 = vmatpush.bf16.msrb.mxu2 %v2296_v59  ;;  %706 = vmatpush.bf16.msra.mxu3 %v2280_v63  ;;  %v3207_v40 = vld [vmem:[#allocation7 + $0x4] sm:$0xf]  ;;  %v2245_v41 = vld [vmem:[#allocation7 + $0xc] sm:$0xf0]  ;;  %v3254_v44 = vld [vmem:[#allocation7 + $0x178] sm:$0xf0]  ;;  %v2448_v47 = vor.u32 %v3259_v36, %v2447_v34  ;;  %v2364_v48 = vor.u32 %v3238_v38, %v2363_v37 }
  0x34   :  { %v2431_v43 = vld [vmem:[#allocation7 + $0x170] sm:$0xf]  ;;  %v3249_v45 = vld [vmem:[#allocation7 + $0x154] sm:$0xf]  ;;  %v2413_v46 = vld [vmem:[#allocation7 + $0x15c] sm:$0xf0]  ;;  %v2248_v49 = vor.u32 %v3207_v40, %v2245_v41 }
  0x35   :  { %2239 = vmatmul.msk.bf16.vlgmr.msrb.gmra.mxu1 %vm165_vm0, %v3691_v23  ;;  %718 = vmatpush.bf16.msra.mxu0 %v2388_v20  ;;  %v2260_v23 = vor.u32 %v3210_v27, %v2257_v28  ;;  %v2435_v50 = vld [vmem:[#allocation7 + $0x180] sm:$0xf]  ;;  %v3256_v51 = vld [vmem:[#allocation7 + $0x188] sm:$0xf0]  ;;  %v2432_v52 = vor.u32 %v3254_v44, %v2431_v43  ;;  %v2335_v53 = vld [vmem:[#allocation7 + $0xb0] sm:$0xf]  ;;  %v2416_v55 = vor.u32 %v3249_v45, %v2413_v46 }
  0x36   :  { %730 = vmatpush.bf16.msra.mxu1 %v2496_v56  ;;  %v3230_v54 = vld [vmem:[#allocation7 + $0xb8] sm:$0xf0]  ;;  %v2419_v56 = vld [vmem:[#allocation7 + $0x158] sm:$0xf]  ;;  %v3251_v57 = vld [vmem:[#allocation7 + $0x160] sm:$0xf0]  ;;  %v2436_v60 = vor.u32 %v3256_v51, %v2435_v50 }
  0x37   :  { %745 = vmatpush.bf16.msrb.mxu2 %v2284_v9  ;;  %707 = vmatpush.bf16.msra.mxu3 %v2268_v13  ;;  %v3246_v58 = vld [vmem:[#allocation7 + $0x13c] sm:$0xf]  ;;  %v2401_v59 = vld [vmem:[#allocation7 + $0x144] sm:$0xf0]  ;;  %v2336_v61 = vor.u32 %v3230_v54, %v2335_v53  ;;  %v2420_v62 = vor.u32 %v3251_v57, %v2419_v56  ;;  %v3243_v0 = vld [vmem:[#allocation7 + $0x124] sm:$0xf] }
  0x38   :  { %v2404_v63 = vor.u32 %v3246_v58, %v2401_v59  ;;  %v2389_v1 = vld [vmem:[#allocation7 + $0x12c] sm:$0xf0]  ;;  %v3240_v3 = vld [vmem:[#allocation7 + $0x10c] sm:$0xf]  ;;  %v2377_v4 = vld [vmem:[#allocation7 + $0x114] sm:$0xf0] }
  0x39   :  { %719 = vmatpush.bf16.msra.mxu0 %v2376_v35  ;;  %v2392_v2 = vor.u32 %v3243_v0, %v2389_v1  ;;  %v2380_v5 = vor.u32 %v3240_v3, %v2377_v4  ;;  %v2365_v7 = vld [vmem:[#allocation7 + $0xfc] sm:$0xf0]  ;;  %v3248_v10 = vld [vmem:[#allocation7 + $0x148] sm:$0xf0]  ;;  %v2323_v12 = vld [vmem:[#allocation7 + $0x98] sm:$0xf] }
  0x3a   :  { %731 = vmatpush.bf16.msra.mxu1 %v2484_v6  ;;  %v3237_v6 = vld [vmem:[#allocation7 + $0xf4] sm:$0xf]  ;;  %v2407_v9 = vld [vmem:[#allocation7 + $0x140] sm:$0xf]  ;;  %v3227_v13 = vld [vmem:[#allocation7 + $0xa0] sm:$0xf0] }
  0x3b   :  { %746 = vmatpush.bf16.msrb.mxu2 %v2272_v21  ;;  %708 = vmatpush.bf16.msra.mxu3 %v2256_v26  ;;  %v2368_v8 = vor.u32 %v3237_v6, %v2365_v7  ;;  %v2408_v11 = vor.u32 %v3248_v10, %v2407_v9  ;;  %v2324_v14 = vor.u32 %v3227_v13, %v2323_v12  ;;  %v2351_v15 = vld [vmem:[#allocation7 + $0xd8] sm:$0xf]  ;;  %v3235_v16 = vld [vmem:[#allocation7 + $0xe0] sm:$0xf0]  ;;  %v3234_v17 = vld [vmem:[#allocation7 + $0xdc] sm:$0xf] }
  0x3c   :  { %v2353_v19 = vld [vmem:[#allocation7 + $0xe4] sm:$0xf0]  ;;  %v3245_v21 = vld [vmem:[#allocation7 + $0x130] sm:$0xf0]  ;;  %v2311_v25 = vld [vmem:[#allocation7 + $0x80] sm:$0xf] }
  0x3d   :  { %720 = vmatpush.bf16.msra.mxu0 %v2364_v48  ;;  %v2395_v20 = vld [vmem:[#allocation7 + $0x128] sm:$0xf]  ;;  %v2356_v22 = vor.u32 %v3234_v17, %v2353_v19  ;;  %v3224_v26 = vld [vmem:[#allocation7 + $0x88] sm:$0xf0]  ;;  %v2339_v28 = vld [vmem:[#allocation7 + $0xc0] sm:$0xf] }
  0x3e   :  { %732 = vmatpush.bf16.msra.mxu1 %v2472_v18  ;;  %v2352_v18 = vor.u32 %v3235_v16, %v2351_v15  ;;  %v2396_v24 = vor.u32 %v3245_v21, %v2395_v20  ;;  %v2312_v27 = vor.u32 %v3224_v26, %v2311_v25  ;;  %v3232_v29 = vld [vmem:[#allocation7 + $0xc8] sm:$0xf0]  ;;  %v3231_v31 = vld [vmem:[#allocation7 + $0xc4] sm:$0xf]  ;;  %v2341_v32 = vld [vmem:[#allocation7 + $0xcc] sm:$0xf0] }
  0x3f   :  { %747 = vmatpush.bf16.msrb.mxu2 %v2260_v23  ;;  %709 = vmatpush.bf16.msra.mxu3 %v2244_v39  ;;  %v2340_v30 = vor.u32 %v3232_v29, %v2339_v28  ;;  %v2344_v34 = vor.u32 %v3231_v31, %v2341_v32  ;;  %v2521_v35 = vld [vmem:[#allocation7 + $0x234] sm:$0xf0]  ;;  %v2383_v23 = vld [vmem:[#allocation7 + $0x110] sm:$0xf]  ;;  %v3242_v36 = vld [vmem:[#allocation7 + $0x118] sm:$0xf0] }
  0x40   :  { %v2384_v38 = vor.u32 %v3242_v36, %v2383_v23  ;;  %v2299_v39 = vld [vmem:[#allocation7 + $0x68] sm:$0xf]  ;;  %v3221_v40 = vld [vmem:[#allocation7 + $0x70] sm:$0xf0]  ;;  %v2509_v43 = vld [vmem:[#allocation7 + $0x21c] sm:$0xf0] }
  0x41   :  { %721 = vmatpush.bf16.msra.mxu0 %v2352_v18  ;;  %v2300_v41 = vor.u32 %v3221_v40, %v2299_v39  ;;  %v2371_v44 = vld [vmem:[#allocation7 + $0xf8] sm:$0xf]  ;;  %v3239_v46 = vld [vmem:[#allocation7 + $0x100] sm:$0xf0]  ;;  %v2287_v48 = vld [vmem:[#allocation7 + $0x50] sm:$0xf] }
  0x42   :  { %733 = vmatpush.bf16.msra.mxu1 %v2460_v33  ;;  %v3276_v33 = vld [vmem:[#allocation7 + $0x22c] sm:$0xf]  ;;  %v3270_v51 = vld [vmem:[#allocation7 + $0x1fc] sm:$0xf]  ;;  %v2359_v54 = vld [vmem:[#allocation7 + $0xe0] sm:$0xf] }
  0x43   :  { %754 = vmatpush.bf16.msrb.mxu3 %v2428_v42  ;;  %748 = vmatpush.bf16.msrb.mxu2 %v2248_v49  ;;  %v2524_v37 = vor.u32 %v3276_v33, %v2521_v35  ;;  %v3273_v42 = vld [vmem:[#allocation7 + $0x214] sm:$0xf]  ;;  %v3218_v49 = vld [vmem:[#allocation7 + $0x58] sm:$0xf0]  ;;  %v2275_v57 = vld [vmem:[#allocation7 + $0x38] sm:$0xf] }
  0x44   :  { %v2512_v45 = vor.u32 %v3273_v42, %v2509_v43  ;;  %v2288_v50 = vor.u32 %v3218_v49, %v2287_v48  ;;  %v3215_v58 = vld [vmem:[#allocation7 + $0x40] sm:$0xf0]  ;;  %v3233_v0 = vld [vmem:[#allocation7 + $0xd0] sm:$0xf0]  ;;  %v3212_v3 = vld [vmem:[#allocation7 + $0x28] sm:$0xf0] }
  0x45   :  { %722 = vmatpush.bf16.msra.mxu0 %v2340_v30  ;;  %v2276_v59 = vor.u32 %v3215_v58, %v2275_v57  ;;  %v2473_v6 = vld [vmem:[#allocation7 + $0x1d4] sm:$0xf0]  ;;  %v3209_v9 = vld [vmem:[#allocation7 + $0x10] sm:$0xf0]  ;;  %v2461_v12 = vld [vmem:[#allocation7 + $0x1bc] sm:$0xf0] }
  0x46   :  { %734 = vmatpush.bf16.msra.mxu1 %v2448_v47  ;;  %v2372_v47 = vor.u32 %v3239_v46, %v2371_v44  ;;  %v3261_v10 = vld [vmem:[#allocation7 + $0x1b4] sm:$0xf]  ;;  %v125_v13 = vld [vmem:[#allocation6] sm:$0x7]  ;;  %v2449_v17 = vld [vmem:[#allocation7 + $0x1a4] sm:$0xf0] }
  0x47   :  { %793 = vmatpush.bf16.msra.mxu2 %v2432_v52  ;;  %755 = vmatpush.bf16.msrb.mxu3 %v2416_v55  ;;  %v2497_v52 = vld [vmem:[#allocation7 + $0x204] sm:$0xf0]  ;;  %v3236_v55 = vld [vmem:[#allocation7 + $0xe8] sm:$0xf0]  ;;  %v127_v15 = vperm.slane %v125_v13, 0  ;;  %v129_v28 = vperm.slane %v125_v13, 2 }
  0x48   :  { %v2500_v53 = vor.u32 %v3270_v51, %v2497_v52  ;;  %v2360_v56 = vor.u32 %v3236_v55, %v2359_v54  ;;  %v3258_v16 = vld [vmem:[#allocation7 + $0x19c] sm:$0xf]  ;;  %v3255_v20 = vld [vmem:[#allocation7 + $0x184] sm:$0xf]  ;;  %v2437_v21 = vld [vmem:[#allocation7 + $0x18c] sm:$0xf0] }
  0x49   :  { %767 = vmatpush.bf16.msrb.mxu0 %v2524_v37  ;;  %v2452_v18 = vor.u32 %v3258_v16, %v2449_v17  ;;  %v3278_v25 = vld [vmem:[#allocation7 + $0x238] sm:$0xf0]  ;;  %v2440_v26 = vor.u32 %v3255_v20, %v2437_v21  ;;  %v2515_v31 = vld [vmem:[#allocation7 + $0x218] sm:$0xf]  ;;  %v3275_v32 = vld [vmem:[#allocation7 + $0x220] sm:$0xf0] }
  0x4a   :  { %735 = vmatpush.bf16.msra.mxu1 %v2436_v60  ;;  %v3267_v60 = vld [vmem:[#allocation7 + $0x1e4] sm:$0xf]  ;;  %v2516_v23 = vor.u32 %v3275_v32, %v2515_v31  ;;  %v2503_v36 = vld [vmem:[#allocation7 + $0x200] sm:$0xf]  ;;  %v3272_v37 = vld [vmem:[#allocation7 + $0x208] sm:$0xf0] }
  0x4b   :  { %794 = vmatpush.bf16.msra.mxu2 %v2420_v62  ;;  %756 = vmatpush.bf16.msrb.mxu3 %v2404_v63  ;;  %v2347_v62 = vld [vmem:[#allocation7 + $0xc8] sm:$0xf]  ;;  %v2504_v40 = vor.u32 %v3272_v37, %v2503_v36  ;;  %v3269_v43 = vld [vmem:[#allocation7 + $0x1f0] sm:$0xf0]  ;;  %v3266_v49 = vld [vmem:[#allocation7 + $0x1d8] sm:$0xf0] }
  0x4c   :  { %v2348_v1 = vor.u32 %v3233_v0, %v2347_v62  ;;  %v2491_v42 = vld [vmem:[#allocation7 + $0x1e8] sm:$0xf]  ;;  %v3387_v51 = vld [vmem:[#allocation9 + $0x360] sm:$0xf0]  ;;  %v2467_v57 = vld [vmem:[#allocation7 + $0x1b8] sm:$0xf] }
  0x4d   :  { %768 = vmatpush.bf16.msrb.mxu0 %v2512_v45  ;;  %v2492_v46 = vor.u32 %v3269_v43, %v2491_v42  ;;  %v2727_v52 = vld [vmem:[#allocation9 + $0x188] sm:$0xf]  ;;  %v3263_v58 = vld [vmem:[#allocation7 + $0x1c0] sm:$0xf0]  ;;  %v2923_v62 = vld [vmem:[#allocation9 + $0x310] sm:$0xf] }
  0x4e   :  { %780 = vmatpush.bf16.msrb.mxu1 %v2336_v61  ;;  %v2485_v61 = vld [vmem:[#allocation7 + $0x1ec] sm:$0xf0]  ;;  %v3324_v0 = vld [vmem:[#allocation9 + $0x168] sm:$0xf0]  ;;  %v2443_v17 = vld [vmem:[#allocation7 + $0x188] sm:$0xf] }
  0x4f   :  { %757 = vmatpush.bf16.msrb.mxu3 %v2392_v2  ;;  %795 = vmatpush.bf16.msra.mxu2 %v2408_v11  ;;  %v2488_v63 = vor.u32 %v3267_v60, %v2485_v61  ;;  %v2263_v2 = vld [vmem:[#allocation7 + $0x20] sm:$0xf]  ;;  %v2699_v61 = vld [vmem:[#allocation9 + $0x150] sm:$0xf]  ;;  %v3436_v16 = vld [vmem:[#allocation9 + $0x4e8] sm:$0xf0] }
  0x50   :  { %v2264_v4 = vor.u32 %v3212_v3, %v2263_v2  ;;  %v3175_v2 = vld [vmem:[#allocation9 + $0x508] sm:$0xf]  ;;  %v3443_v3 = vld [vmem:[#allocation9 + $0x520] sm:$0xf0]  ;;  %v3257_v20 = vld [vmem:[#allocation7 + $0x190] sm:$0xf0] }
  0x51   :  { %769 = vmatpush.bf16.msrb.mxu0 %v2500_v53  ;;  %v3331_v53 = vld [vmem:[#allocation9 + $0x1a0] sm:$0xf0]  ;;  %v3328_v21 = vld [vmem:[#allocation9 + $0x18c] sm:$0xf]  ;;  %v3119_v31 = vld [vmem:[#allocation9 + $0x498] sm:$0xf] }
  0x52   :  { %781 = vmatpush.bf16.msrb.mxu1 %v2324_v14  ;;  %v2464_v14 = vor.u32 %v3261_v10, %v2461_v12  ;;  %v2728_v60 = vor.u32 %v3331_v53, %v2727_v52  ;;  %v2671_v10 = vld [vmem:[#allocation9 + $0x118] sm:$0xf]  ;;  %v3373_v12 = vld [vmem:[#allocation9 + $0x2f0] sm:$0xf0]  ;;  %v2701_v36 = vld [vmem:[#allocation9 + $0x16c] sm:$0xf0] }
  0x53   :  { %758 = vmatpush.bf16.msrb.mxu3 %v2380_v5  ;;  %796 = vmatpush.bf16.msra.mxu2 %v2396_v24  ;;  %v3264_v5 = vld [vmem:[#allocation7 + $0x1cc] sm:$0xf]  ;;  %v2527_v24 = vld [vmem:[#allocation7 + $0x230] sm:$0xf]  ;;  %v3429_v32 = vld [vmem:[#allocation9 + $0x4b0] sm:$0xf0] }
  0x54   :  { %v2476_v7 = vor.u32 %v3264_v5, %v2473_v6  ;;  %v2528_v29 = vor.u32 %v3278_v25, %v2527_v24  ;;  %v2468_v6 = vor.u32 %v3263_v58, %v2467_v57  ;;  %v2643_v25 = vld [vmem:[#allocation9 + $0xe0] sm:$0xf]  ;;  %v3359_v42 = vld [vmem:[#allocation9 + $0x280] sm:$0xf0]  ;;  %v2811_v52 = vld [vmem:[#allocation9 + $0x230] sm:$0xf] }
  0x55   :  { %770 = vmatpush.bf16.msrb.mxu0 %v2488_v63  ;;  %v3380_v63 = vld [vmem:[#allocation9 + $0x328] sm:$0xf0]  ;;  %v3091_v43 = vld [vmem:[#allocation9 + $0x460] sm:$0xf] }
  0x56   :  { %782 = vmatpush.bf16.msrb.mxu1 %v2312_v27  ;;  %v3352_v53 = vld [vmem:[#allocation9 + $0x248] sm:$0xf0] }
  0x57   :  { %759 = vmatpush.bf16.msrb.mxu3 %v2368_v8  ;;  %797 = vmatpush.bf16.msra.mxu2 %v2384_v38  ;;  %v2251_v8 = vld [vmem:[#allocation7 + $0x8] sm:$0xf] }
  0x58   :  { %v2252_v11 = vor.u32 %v3209_v9, %v2251_v8  ;;  %v3260_v8 = vld [vmem:[#allocation7 + $0x1a8] sm:$0xf0]  ;;  %v2700_v9 = vor.u32 %v3324_v0, %v2699_v61  ;;  %v2783_v0 = vld [vmem:[#allocation9 + $0x1f8] sm:$0xf] }
  0x59   :  { %771 = vmatpush.bf16.msrb.mxu0 %v2476_v7  ;;  %v2455_v7 = vld [vmem:[#allocation7 + $0x1a0] sm:$0xf] }
  0x5a   :  { %783 = vmatpush.bf16.msrb.mxu1 %v2300_v41  ;;  %v128_v41 = vperm.slane %v125_v13, 1  ;;  %v3317_v13 = vld [vmem:[#allocation9 + $0x130] sm:$0xf0] }
  0x5b   :  { %760 = vmatpush.bf16.msrb.mxu3 %v2356_v22  ;;  %798 = vmatpush.bf16.msra.mxu2 %v2372_v47  ;;  %v2479_v47 = vld [vmem:[#allocation7 + $0x1d0] sm:$0xf]  ;;  %v2672_v24 = vor.u32 %v3317_v13, %v2671_v10 }
  0x5c   :  { %v2589_v13 = vld [vmem:[#allocation9 + $0x8c] sm:$0xf0] }
  0x5d   :  { %772 = vmatpush.bf16.msrb.mxu0 %v2464_v14 }
  0x5e   :  { %784 = vmatpush.bf16.msrb.mxu1 %v2288_v50  ;;  %v2951_v50 = vld [vmem:[#allocation9 + $0x348] sm:$0xf] }
  0x5f   :  { %761 = vmatpush.bf16.msrb.mxu3 %v2344_v34  ;;  %799 = vmatpush.bf16.msra.mxu2 %v2360_v56  ;;  %v2952_v54 = vor.u32 %v3387_v51, %v2951_v50  ;;  %v2480_v56 = vor.u32 %v3266_v49, %v2479_v47  ;;  %v2587_v50 = vld [vmem:[#allocation9 + $0x70] sm:$0xf]  ;;  %v3296_v51 = vld [vmem:[#allocation9 + $0x88] sm:$0xf0] }
  0x60   :  { %v2588_v61 = vor.u32 %v3296_v51, %v2587_v50  ;;  %v3177_v50 = vld [vmem:[#allocation9 + $0x524] sm:$0xf0] }
  0x61   :  { %773 = vmatpush.bf16.msrb.mxu0 %v2452_v18 }
  0x62   :  { %785 = vmatpush.bf16.msrb.mxu1 %v2276_v59 }
  0x63   :  { %800 = vmatpush.bf16.msra.mxu2 %v2348_v1  ;;  %v2924_v1 = vor.u32 %v3380_v63, %v2923_v62  ;;  %v2559_v62 = vld [vmem:[#allocation9 + $0x38] sm:$0xf]  ;;  %v3289_v63 = vld [vmem:[#allocation9 + $0x50] sm:$0xf0] }
  0x65   :  { %774 = vmatpush.bf16.msrb.mxu0 %v2440_v26  ;;  %v2867_v26 = vld [vmem:[#allocation9 + $0x2a0] sm:$0xf] }
  0x66   :  { %786 = vmatpush.bf16.msrb.mxu1 %v2264_v4  ;;  %v3176_v4 = vor.u32 %v3443_v3, %v3175_v2 }
  0x6a   :  { %787 = vmatpush.bf16.msrb.mxu1 %v2252_v11  ;;  %v2895_v11 = vld [vmem:[#allocation9 + $0x2d8] sm:$0xf] }
  0x6b   :  { %v2896_v14 = vor.u32 %v3373_v12, %v2895_v11  ;;  %v3293_v12 = vld [vmem:[#allocation9 + $0x74] sm:$0xf] }
  0xa2   :  { %v178_v19 = vpop.f32.mrf.mxu1 }
  0xa3   :  { %v179_v22 = vadd.f32 %v178_v19, %v127_v15  ;;  %v3147_v15 = vld [vmem:[#allocation9 + $0x4d0] sm:$0xf]  ;;  %v2456_v19 = vor.u32 %v3260_v8, %v2455_v7  ;;  %v3282_v7 = vld [vmem:[#allocation9 + $0x18] sm:$0xf0]  ;;  %v3384_v8 = vld [vmem:[#allocation9 + $0x34c] sm:$0xf] }
  0xa4   :  { %v3148_v18 = vor.u32 %v3436_v16, %v3147_v15  ;;  %v3377_v15 = vld [vmem:[#allocation9 + $0x314] sm:$0xf]  ;;  %v2925_v16 = vld [vmem:[#allocation9 + $0x32c] sm:$0xf0] }
  0xa5   :  { %v208_v27 = vmax.f32 %v179_v22, 0.0  ;;  %v2729_v22 = vld [vmem:[#allocation9 + $0x1a4] sm:$0xf0] }
  0xa7   :  { %v3699_v30 = vpack.c.bf16 %v208_v27, %v208_v27  ;;  %v3366_v27 = vld [vmem:[#allocation9 + $0x2b8] sm:$0xf0] }
  0xa9   :  { %v204_v33 = vpop.f32.mrf.mxu2  ;;  %710 = vmatmul.bf16.vlgmr.msra.gmra.mxu3 %v3699_v30  ;;  %749 = vmatmul.bf16.vlgmr.msrb.gmra.mxu2 %v3699_v30 }
  0xaa   :  { %v205_v34 = vadd.f32 %v204_v33, %v129_v28  ;;  %v180_v35 = vpop.f32.mrf.mxu1  ;;  %806 = vmatpush.bf16.msra.mxu3 %v2528_v29  ;;  %1923 = vmatpush.bf16.msrb.mxu2 %v3176_v4  ;;  %v3310_v28 = vld [vmem:[#allocation9 + $0xf8] sm:$0xf0]  ;;  %v2868_v29 = vor.u32 %v3366_v27, %v2867_v26  ;;  %v3120_v33 = vor.u32 %v3429_v32, %v3119_v31  ;;  %v3300_v4 = vld [vmem:[#allocation9 + $0xac] sm:$0xf]  ;;  %v2533_v26 = vld [vmem:[#allocation9 + $0x1c] sm:$0xf0] }
  0xab   :  { %v2732_v35 = vor.u32 %v3328_v21, %v2729_v22  ;;  %v2644_v37 = vor.u32 %v3310_v28, %v2643_v25  ;;  %v3370_v21 = vld [vmem:[#allocation9 + $0x2dc] sm:$0xf]  ;;  %v2897_v22 = vld [vmem:[#allocation9 + $0x2f4] sm:$0xf0]  ;;  %v3279_v25 = vld [vmem:[#allocation9 + $0x4] sm:$0xf] }
  0xac   :  { %v210_v38 = vmax.f32 %v205_v34, 0.0  ;;  %v2444_v34 = vor.u32 %v3257_v20, %v2443_v17  ;;  %v2592_v17 = vor.u32 %v3293_v12, %v2589_v13  ;;  %v2928_v20 = vor.u32 %v3377_v15, %v2925_v16  ;;  %v2959_v28 = vld [vmem:[#allocation9 + $0x350] sm:$0xf]  ;;  %v3426_v12 = vld [vmem:[#allocation9 + $0x49c] sm:$0xf] }
  0xad   :  { %v2900_v27 = vor.u32 %v3370_v21, %v2897_v22  ;;  %v2536_v31 = vor.u32 %v3279_v25, %v2533_v26  ;;  %v3121_v13 = vld [vmem:[#allocation9 + $0x4b4] sm:$0xf0]  ;;  %v3342_v15 = vld [vmem:[#allocation9 + $0x1fc] sm:$0xf]  ;;  %v3419_v25 = vld [vmem:[#allocation9 + $0x464] sm:$0xf] }
  0xae   :  { %v3703_v39 = vpack.c.bf16 %v210_v38, %v210_v38  ;;  %807 = vmatpush.bf16.msra.mxu3 %v2516_v23  ;;  %1924 = vmatpush.bf16.msrb.mxu2 %v3148_v18  ;;  %v3321_v23 = vld [vmem:[#allocation9 + $0x154] sm:$0xf]  ;;  %v2615_v38 = vld [vmem:[#allocation9 + $0xa8] sm:$0xf]  ;;  %v3286_v18 = vld [vmem:[#allocation9 + $0x3c] sm:$0xf] }
  0xaf   :  { %v2704_v47 = vor.u32 %v3321_v23, %v2701_v36  ;;  %v2903_v23 = vld [vmem:[#allocation9 + $0x2e0] sm:$0xf]  ;;  %v3374_v36 = vld [vmem:[#allocation9 + $0x2f8] sm:$0xf0]  ;;  %v2785_v16 = vld [vmem:[#allocation9 + $0x214] sm:$0xf0] }
  0xb0   :  { %736 = vmatmul.bf16.vlgmr.msra.gmra.mxu1 %v3703_v39  ;;  %v3346_v21 = vld [vmem:[#allocation9 + $0x218] sm:$0xf0]  ;;  %v3093_v26 = vld [vmem:[#allocation9 + $0x47c] sm:$0xf0] }
  0xb1   :  { %v206_v44 = vpop.f32.mrf.mxu2  ;;  %1910 = vmatpush.bf16.msra.mxu1 %v2952_v54  ;;  %v3063_v54 = vld [vmem:[#allocation9 + $0x428] sm:$0xf] }
  0xb2   :  { %v191_v45 = vpop.f32.mrf.mxu1  ;;  %808 = vmatpush.bf16.msra.mxu3 %v2504_v40  ;;  %v3303_v40 = vld [vmem:[#allocation9 + $0xc0] sm:$0xf0]  ;;  %1925 = vmatpush.bf16.msrb.mxu2 %v3120_v33  ;;  %v3422_v44 = vld [vmem:[#allocation9 + $0x478] sm:$0xf0]  ;;  %v2931_v33 = vld [vmem:[#allocation9 + $0x318] sm:$0xf] }
  0xb3   :  { %v192_v48 = vadd.f32 %v191_v45, %v128_v41  ;;  %v2839_v41 = vld [vmem:[#allocation9 + $0x268] sm:$0xf]  ;;  %v3314_v45 = vld [vmem:[#allocation9 + $0x11c] sm:$0xf]  ;;  %v2616_v49 = vor.u32 %v3303_v40, %v2615_v38  ;;  %v3035_v38 = vld [vmem:[#allocation9 + $0x3f0] sm:$0xf] }
  0xb4   :  { %v3408_v40 = vld [vmem:[#allocation9 + $0x408] sm:$0xf0] }
  0xb5   :  { %v209_v55 = vmax.f32 %v192_v48, 0.0  ;;  %1911 = vmatpush.bf16.msra.mxu1 %v2924_v1  ;;  %v2673_v48 = vld [vmem:[#allocation9 + $0x134] sm:$0xf0]  ;;  %v3345_v1 = vld [vmem:[#allocation9 + $0x210] sm:$0xf0] }
  0xb6   :  { %809 = vmatpush.bf16.msra.mxu3 %v2492_v46  ;;  %v3092_v46 = vor.u32 %v3422_v44, %v3091_v43  ;;  %v2676_v58 = vor.u32 %v3314_v45, %v2673_v48  ;;  %v2784_v2 = vor.u32 %v3345_v1, %v2783_v0  ;;  %v2875_v44 = vld [vmem:[#allocation9 + $0x2a8] sm:$0xf]  ;;  %v3367_v45 = vld [vmem:[#allocation9 + $0x2c0] sm:$0xf0]  ;;  %v3338_v48 = vld [vmem:[#allocation9 + $0x1d8] sm:$0xf0] }
  0xb7   :  { %v212_v59 = vpack.c.bf16 %v209_v55, %v209_v55  ;;  %v2812_v55 = vor.u32 %v3352_v53, %v2811_v52  ;;  %v3007_v53 = vld [vmem:[#allocation9 + $0x3b8] sm:$0xf]  ;;  %v2979_v1 = vld [vmem:[#allocation9 + $0x380] sm:$0xf] }
  0xb8   :  { %1926 = vmatpush.bf16.msrb.mxu2 %v3092_v46  ;;  %v2755_v46 = vld [vmem:[#allocation9 + $0x1c0] sm:$0xf] }
  0xb9   :  { %723 = vmatmul.bf16.vlgmr.msra.gmra.mxu0 %v212_v59  ;;  %762 = vmatmul.bf16.vlgmr.msrb.gmra.mxu3 %v212_v59  ;;  %v2756_v51 = vor.u32 %v3338_v48, %v2755_v46  ;;  %v2623_v46 = vld [vmem:[#allocation9 + $0xb0] sm:$0xf] }
  0xba   :  { %801 = vmatmul.bf16.vlgmr.msra.gmra.mxu2 %v212_v59  ;;  %v193_v5 = vpop.f32.mrf.mxu1  ;;  %810 = vmatpush.bf16.msra.mxu3 %v2480_v56  ;;  %v3415_v56 = vld [vmem:[#allocation9 + $0x440] sm:$0xf0] }
  0xbb   :  { %1897 = vmatpush.bf16.msra.mxu0 %v2728_v60  ;;  %1912 = vmatpush.bf16.msra.mxu1 %v2896_v14  ;;  %v3064_v57 = vor.u32 %v3415_v56, %v3063_v54  ;;  %v3307_v59 = vld [vmem:[#allocation9 + $0xe4] sm:$0xf]  ;;  %v2645_v60 = vld [vmem:[#allocation9 + $0xfc] sm:$0xf0]  ;;  %v2617_v5 = vld [vmem:[#allocation9 + $0xc4] sm:$0xf0] }
  0xbc   :  { %v2648_v3 = vor.u32 %v3307_v59, %v2645_v60  ;;  %v2620_v10 = vor.u32 %v3300_v4, %v2617_v5  ;;  %v3401_v54 = vld [vmem:[#allocation9 + $0x3d0] sm:$0xf0]  ;;  %v3360_v59 = vld [vmem:[#allocation9 + $0x288] sm:$0xf0]  ;;  %v2735_v5 = vld [vmem:[#allocation9 + $0x190] sm:$0xf] }
  0xbd   :  { %1927 = vmatpush.bf16.msrb.mxu2 %v3064_v57  ;;  %v3008_v56 = vor.u32 %v3401_v54, %v3007_v53  ;;  %v2841_v57 = vld [vmem:[#allocation9 + $0x284] sm:$0xf0]  ;;  %v3349_v4 = vld [vmem:[#allocation9 + $0x234] sm:$0xf] }
  0xbe   :  { %811 = vmatpush.bf16.msra.mxu3 %v2468_v6  ;;  %v2531_v6 = vld [vmem:[#allocation9] sm:$0xf]  ;;  %v3297_v53 = vld [vmem:[#allocation9 + $0x90] sm:$0xf0] }
  0xbf   :  { %1898 = vmatpush.bf16.msra.mxu0 %v2700_v9  ;;  %1913 = vmatpush.bf16.msra.mxu1 %v2868_v29  ;;  %v2953_v9 = vld [vmem:[#allocation9 + $0x364] sm:$0xf0]  ;;  %v2532_v11 = vor.u32 %v3282_v7, %v2531_v6  ;;  %v3388_v29 = vld [vmem:[#allocation9 + $0x368] sm:$0xf0] }
  0xc0   :  { %788 = vmatmul.bf16.vlgmr.msrb.gmra.mxu1 %v3699_v30  ;;  %v2840_v30 = vor.u32 %v3359_v42, %v2839_v41  ;;  %v2956_v14 = vor.u32 %v3384_v8, %v2953_v9  ;;  %v2960_v32 = vor.u32 %v3388_v29, %v2959_v28  ;;  %v3036_v41 = vor.u32 %v3408_v40, %v3035_v38  ;;  %v3363_v42 = vld [vmem:[#allocation9 + $0x2a4] sm:$0xf]  ;;  %v3332_v7 = vld [vmem:[#allocation9 + $0x1a8] sm:$0xf0]  ;;  %v2819_v8 = vld [vmem:[#allocation9 + $0x238] sm:$0xf] }
  0xc1   :  { %v3353_v9 = vld [vmem:[#allocation9 + $0x250] sm:$0xf0]  ;;  %v3335_v28 = vld [vmem:[#allocation9 + $0x1c4] sm:$0xf]  ;;  %v2757_v29 = vld [vmem:[#allocation9 + $0x1dc] sm:$0xf0] }
  0xc2   :  { %812 = vmatpush.bf16.msra.mxu3 %v2456_v19  ;;  %v2561_v19 = vld [vmem:[#allocation9 + $0x54] sm:$0xf0]  ;;  %1928 = vmatpush.bf16.msrb.mxu2 %v3036_v41  ;;  %v3065_v38 = vld [vmem:[#allocation9 + $0x444] sm:$0xf0]  ;;  %v3311_v41 = vld [vmem:[#allocation9 + $0x100] sm:$0xf0] }
  0xc3   :  { %1899 = vmatpush.bf16.msra.mxu0 %v2672_v24  ;;  %1914 = vmatpush.bf16.msra.mxu1 %v2840_v30  ;;  %v2564_v24 = vor.u32 %v3286_v18, %v2561_v19  ;;  %v2869_v30 = vld [vmem:[#allocation9 + $0x2bc] sm:$0xf0]  ;;  %v2788_v18 = vor.u32 %v3342_v15, %v2785_v16  ;;  %v3325_v19 = vld [vmem:[#allocation9 + $0x170] sm:$0xf0]  ;;  %v2651_v40 = vld [vmem:[#allocation9 + $0xe8] sm:$0xf] }
  0xc4   :  { %v2872_v43 = vor.u32 %v3363_v42, %v2869_v30  ;;  %v2652_v30 = vor.u32 %v3311_v41, %v2651_v40  ;;  %v3099_v41 = vld [vmem:[#allocation9 + $0x468] sm:$0xf] }
  0xc6   :  { %813 = vmatpush.bf16.msra.mxu3 %v2444_v34  ;;  %v3381_v34 = vld [vmem:[#allocation9 + $0x330] sm:$0xf0]  ;;  %1929 = vmatpush.bf16.msrb.mxu2 %v3008_v56  ;;  %v2981_v56 = vld [vmem:[#allocation9 + $0x39c] sm:$0xf0] }
  0xc7   :  { %1900 = vmatpush.bf16.msra.mxu0 %v2644_v37  ;;  %1915 = vmatpush.bf16.msra.mxu1 %v2812_v55  ;;  %v2904_v37 = vor.u32 %v3374_v36, %v2903_v23  ;;  %v3356_v55 = vld [vmem:[#allocation9 + $0x26c] sm:$0xf]  ;;  %v3339_v23 = vld [vmem:[#allocation9 + $0x1e0] sm:$0xf0] }
  0xc8   :  { %v2844_v60 = vor.u32 %v3356_v55, %v2841_v57  ;;  %v3391_v55 = vld [vmem:[#allocation9 + $0x384] sm:$0xf] }
  0xc9   :  { %775 = vmatmul.bf16.vlgmr.msrb.gmra.mxu0 %v3703_v39  ;;  %814 = vmatmul.bf16.vlgmr.msra.gmra.mxu3 %v3703_v39  ;;  %v2560_v39 = vor.u32 %v3289_v63, %v2559_v62  ;;  %v3433_v62 = vld [vmem:[#allocation9 + $0x4d4] sm:$0xf]  ;;  %v3149_v63 = vld [vmem:[#allocation9 + $0x4ec] sm:$0xf0]  ;;  %v2984_v57 = vor.u32 %v3391_v55, %v2981_v56  ;;  %v3416_v55 = vld [vmem:[#allocation9 + $0x448] sm:$0xf0] }
  0xca   :  { %1936 = vmatpush.bf16.msrb.mxu3 %v2732_v35  ;;  %v2932_v35 = vor.u32 %v3381_v34, %v2931_v33  ;;  %v3152_v0 = vor.u32 %v3433_v62, %v3149_v63  ;;  %v3318_v33 = vld [vmem:[#allocation9 + $0x138] sm:$0xf0]  ;;  %v2763_v34 = vld [vmem:[#allocation9 + $0x1c8] sm:$0xf] }
  0xcb   :  { %1901 = vmatpush.bf16.msra.mxu0 %v2616_v49  ;;  %1916 = vmatpush.bf16.msra.mxu1 %v2784_v2  ;;  %v3440_v49 = vld [vmem:[#allocation9 + $0x50c] sm:$0xf]  ;;  %v3394_v2 = vld [vmem:[#allocation9 + $0x398] sm:$0xf0]  ;;  %v2764_v36 = vor.u32 %v3339_v23, %v2763_v34  ;;  %v3427_v34 = vld [vmem:[#allocation9 + $0x4a4] sm:$0xf] }
  0xcc   :  { %v3180_v52 = vor.u32 %v3440_v49, %v3177_v50  ;;  %v3398_v49 = vld [vmem:[#allocation9 + $0x3bc] sm:$0xf]  ;;  %v3009_v50 = vld [vmem:[#allocation9 + $0x3d4] sm:$0xf0] }
  0xce   :  { %1937 = vmatpush.bf16.msrb.mxu3 %v2704_v47  ;;  %v2876_v47 = vor.u32 %v3367_v45, %v2875_v44  ;;  %v3037_v44 = vld [vmem:[#allocation9 + $0x40c] sm:$0xf0] }
  0xcf   :  { %1902 = vmatpush.bf16.msra.mxu0 %v2588_v61  ;;  %1917 = vmatpush.bf16.msra.mxu1 %v2756_v51  ;;  %v3012_v51 = vor.u32 %v3398_v49, %v3009_v50  ;;  %v3329_v50 = vld [vmem:[#allocation9 + $0x194] sm:$0xf] }
  0xd2   :  { %1938 = vmatpush.bf16.msrb.mxu3 %v2676_v58  ;;  %v2847_v58 = vld [vmem:[#allocation9 + $0x270] sm:$0xf] }
  0xd3   :  { %1903 = vmatpush.bf16.msra.mxu0 %v2560_v39  ;;  %v2848_v61 = vor.u32 %v3360_v59, %v2847_v58  ;;  %1962 = vmatpush.bf16.msrb.mxu1 %v3180_v52  ;;  %v2813_v39 = vld [vmem:[#allocation9 + $0x24c] sm:$0xf0]  ;;  %v2595_v52 = vld [vmem:[#allocation9 + $0x78] sm:$0xf] }
  0xd4   :  { %v2816_v6 = vor.u32 %v3349_v4, %v2813_v39  ;;  %v2596_v54 = vor.u32 %v3297_v53, %v2595_v52 }
  0xd6   :  { %1939 = vmatpush.bf16.msrb.mxu3 %v2648_v3  ;;  %v2980_v3 = vor.u32 %v3394_v2, %v2979_v1  ;;  %v2539_v1 = vld [vmem:[#allocation9 + $0x8] sm:$0xf]  ;;  %v3283_v2 = vld [vmem:[#allocation9 + $0x20] sm:$0xf0] }
  0xd7   :  { %1904 = vmatpush.bf16.msra.mxu0 %v2532_v11  ;;  %1963 = vmatpush.bf16.msrb.mxu1 %v3152_v0  ;;  %v2820_v11 = vor.u32 %v3353_v9, %v2819_v8  ;;  %v310_v0 = vld [vmem:[%s3764_s4] sm:$0x7]  ;;  %v2540_v4 = vor.u32 %v3283_v2, %v2539_v1 }
  0xd8   :  { %1930 = vmatpush.bf16.msrb.mxu2 %v2980_v3  ;;  %v312_v3 = vperm.slane %v310_v0, 0 }
  0xda   :  { %1940 = vmatpush.bf16.msrb.mxu3 %v2620_v10  ;;  %v2736_v10 = vor.u32 %v3332_v7, %v2735_v5 }
  0xdb   :  { %1949 = vmatpush.bf16.msrb.mxu0 %v2956_v14  ;;  %v3124_v14 = vor.u32 %v3426_v12, %v3121_v13  ;;  %v3444_v12 = vld [vmem:[#allocation9 + $0x528] sm:$0xf0]  ;;  %v3441_v13 = vld [vmem:[#allocation9 + $0x514] sm:$0xf] }
  0xdc   :  { %1975 = vmatpush.bf16.msra.mxu2 %v2736_v10  ;;  %v3183_v10 = vld [vmem:[#allocation9 + $0x510] sm:$0xf] }
  0xdd   :  { %1964 = vmatpush.bf16.msrb.mxu1 %v3124_v14  ;;  %v3185_v14 = vld [vmem:[#allocation9 + $0x52c] sm:$0xf0] }
  0xde   :  { %1941 = vmatpush.bf16.msrb.mxu3 %v2592_v17  ;;  %v2707_v17 = vld [vmem:[#allocation9 + $0x158] sm:$0xf] }
  0xdf   :  { %1950 = vmatpush.bf16.msrb.mxu0 %v2928_v20  ;;  %v2791_v20 = vld [vmem:[#allocation9 + $0x200] sm:$0xf]  ;;  %v2708_v22 = vor.u32 %v3325_v19, %v2707_v17  ;;  %v3184_v17 = vor.u32 %v3444_v12, %v3183_v10  ;;  %v3155_v19 = vld [vmem:[#allocation9 + $0x4d8] sm:$0xf]  ;;  %v3315_v12 = vld [vmem:[#allocation9 + $0x124] sm:$0xf] }
  0xe0   :  { %v3045_v10 = vld [vmem:[#allocation9 + $0x414] sm:$0xf0] }
  0xe1   :  { %1976 = vmatpush.bf16.msra.mxu2 %v2708_v22 }
  0xe2   :  { %1942 = vmatpush.bf16.msrb.mxu3 %v2564_v24  ;;  %v2792_v24 = vor.u32 %v3346_v21, %v2791_v20 }
  0xe3   :  { %1951 = vmatpush.bf16.msrb.mxu0 %v2900_v27  ;;  %v3096_v27 = vor.u32 %v3419_v25, %v3093_v26  ;;  %v3434_v25 = vld [vmem:[#allocation9 + $0x4dc] sm:$0xf]  ;;  %v3157_v26 = vld [vmem:[#allocation9 + $0x4f4] sm:$0xf0] }
  0xe5   :  { %1965 = vmatpush.bf16.msrb.mxu1 %v3096_v27 }
  0xe6   :  { %1943 = vmatpush.bf16.msrb.mxu3 %v2536_v31  ;;  %v2760_v31 = vor.u32 %v3335_v28, %v2757_v29  ;;  %v313_v28 = vperm.slane %v310_v0, 1 }
  0xe7   :  { %1952 = vmatpush.bf16.msrb.mxu0 %v2872_v43  ;;  %v3405_v43 = vld [vmem:[#allocation9 + $0x3f4] sm:$0xf] }
  0xe8   :  { %v3040_v45 = vor.u32 %v3405_v43, %v3037_v44  ;;  %v3423_v44 = vld [vmem:[#allocation9 + $0x480] sm:$0xf0] }
  0xe9   :  { %v3100_v52 = vor.u32 %v3423_v44, %v3099_v41  ;;  %v2743_v41 = vld [vmem:[#allocation9 + $0x198] sm:$0xf] }
  0xea   :  { %1988 = vmatpush.bf16.msra.mxu3 %v2960_v32  ;;  %v2679_v32 = vld [vmem:[#allocation9 + $0x120] sm:$0xf] }
  0xeb   :  { %1953 = vmatpush.bf16.msrb.mxu0 %v2844_v60  ;;  %v2567_v60 = vld [vmem:[#allocation9 + $0x40] sm:$0xf] }
  0xee   :  { %1989 = vmatpush.bf16.msra.mxu3 %v2932_v35  ;;  %v2680_v35 = vor.u32 %v3318_v33, %v2679_v32  ;;  %v3127_v32 = vld [vmem:[#allocation9 + $0x4a0] sm:$0xf]  ;;  %v3430_v33 = vld [vmem:[#allocation9 + $0x4b8] sm:$0xf0] }
  0xef   :  { %1954 = vmatpush.bf16.msrb.mxu0 %v2816_v6 }
  0xf0   :  { %1977 = vmatpush.bf16.msra.mxu2 %v2680_v35  ;;  %v3129_v35 = vld [vmem:[#allocation9 + $0x4bc] sm:$0xf0] }
  0xf1   :  { %v3132_v40 = vor.u32 %v3427_v34, %v3129_v35  ;;  %v3395_v34 = vld [vmem:[#allocation9 + $0x3a0] sm:$0xf0] }
  0xf2   :  { %1990 = vmatpush.bf16.msra.mxu3 %v2904_v37  ;;  %v3412_v37 = vld [vmem:[#allocation9 + $0x42c] sm:$0xf] }
  0xf3   :  { %1955 = vmatpush.bf16.msrb.mxu0 %v2788_v18  ;;  %v3068_v42 = vor.u32 %v3412_v37, %v3065_v38  ;;  %v3188_v18 = vor.u32 %v3441_v13, %v3185_v14  ;;  %v3128_v38 = vor.u32 %v3430_v33, %v3127_v32  ;;  %v2681_v13 = vld [vmem:[#allocation9 + $0x13c] sm:$0xf0]  ;;  %v2987_v33 = vld [vmem:[#allocation9 + $0x388] sm:$0xf] }
  0xf4   :  { %1978 = vmatpush.bf16.msra.mxu2 %v2652_v30  ;;  %v2988_v44 = vor.u32 %v3395_v34, %v2987_v33  ;;  %v3302_v34 = vld [vmem:[#allocation9 + $0xbc] sm:$0xf] }
  0xf5   :  { %1966 = vmatpush.bf16.msrb.mxu1 %v3068_v42 }
  0xf6   :  { %1991 = vmatpush.bf16.msra.mxu3 %v2876_v47  ;;  %v3304_v47 = vld [vmem:[#allocation9 + $0xc8] sm:$0xf0] }
  0xf7   :  { %1956 = vmatpush.bf16.msrb.mxu0 %v2760_v31  ;;  %v2624_v48 = vor.u32 %v3304_v47, %v2623_v46  ;;  %v3160_v31 = vor.u32 %v3434_v25, %v3157_v26  ;;  %v3101_v46 = vld [vmem:[#allocation9 + $0x484] sm:$0xf0]  ;;  %v3399_v25 = vld [vmem:[#allocation9 + $0x3c4] sm:$0xf]  ;;  %v3017_v26 = vld [vmem:[#allocation9 + $0x3dc] sm:$0xf0] }
  0xf8   :  { %v3020_v35 = vor.u32 %v3399_v25, %v3017_v26  ;;  %v3389_v26 = vld [vmem:[#allocation9 + $0x370] sm:$0xf0] }
  0xf9   :  { %1967 = vmatpush.bf16.msrb.mxu1 %v3040_v45  ;;  %1979 = vmatpush.bf16.msra.mxu2 %v2624_v48  ;;  %v3420_v45 = vld [vmem:[#allocation9 + $0x46c] sm:$0xf] }
  0xfa   :  { %1992 = vmatpush.bf16.msra.mxu3 %v2848_v61  ;;  %v3290_v61 = vld [vmem:[#allocation9 + $0x58] sm:$0xf0]  ;;  %v3104_v53 = vor.u32 %v3420_v45, %v3101_v46  ;;  %v3301_v46 = vld [vmem:[#allocation9 + $0xb4] sm:$0xf] }
  0xfb   :  { %v2568_v63 = vor.u32 %v3290_v61, %v2567_v60 }
  0xfd   :  { %1968 = vmatpush.bf16.msrb.mxu1 %v3012_v51  ;;  %1980 = vmatpush.bf16.msra.mxu2 %v2596_v54  ;;  %v2737_v51 = vld [vmem:[#allocation9 + $0x1ac] sm:$0xf0] }
  0xfe   :  { %1993 = vmatpush.bf16.msra.mxu3 %v2820_v11  ;;  %v3071_v54 = vld [vmem:[#allocation9 + $0x430] sm:$0xf] }
  0xff   :  { %v3072_v1 = vor.u32 %v3416_v55, %v3071_v54  ;;  %v3326_v54 = vld [vmem:[#allocation9 + $0x178] sm:$0xf0] }
 0x101   :  { %1969 = vmatpush.bf16.msrb.mxu1 %v2984_v57  ;;  %1981 = vmatpush.bf16.msra.mxu2 %v2568_v63  ;;  %v3413_v57 = vld [vmem:[#allocation9 + $0x434] sm:$0xf]  ;;  %v2709_v63 = vld [vmem:[#allocation9 + $0x174] sm:$0xf0] }
 0x102   :  { %1994 = vmatpush.bf16.msra.mxu3 %v2792_v24  ;;  %v3437_v24 = vld [vmem:[#allocation9 + $0x4f0] sm:$0xf0] }
 0x103   :  { %v3156_v29 = vor.u32 %v3437_v24, %v3155_v19  ;;  %v3402_v19 = vld [vmem:[#allocation9 + $0x3d8] sm:$0xf0]  ;;  %v2684_v24 = vor.u32 %v3315_v12, %v2681_v13  ;;  %v2659_v13 = vld [vmem:[#allocation9 + $0xf0] sm:$0xf] }
 0x105   :  { %1982 = vmatpush.bf16.msra.mxu2 %v2540_v4 }
 0x106   :  { %1995 = vmatpush.bf16.msra.mxu3 %v2764_v36  ;;  %v314_v36 = vperm.slane %v310_v0, 2 }
 0x12c   :  { %v711_v58 = vpop.f32.mrf.mxu3  ;;  %v750_v59 = vpop.f32.mrf.mxu2 }
 0x12d   :  { %v737_v62 = vpop.f32.mrf.mxu1  ;;  %v712_v6 = vadd.f32 %v711_v58, %v312_v3  ;;  %v751_v23 = vadd.f32 %v750_v59, %v313_v28  ;;  %v3073_v58 = vld [vmem:[#allocation9 + $0x44c] sm:$0xf0]  ;;  %v2740_v59 = vor.u32 %v3329_v50, %v2737_v51  ;;  %v3043_v3 = vld [vmem:[#allocation9 + $0x3f8] sm:$0xf]  ;;  %v2653_v28 = vld [vmem:[#allocation9 + $0x104] sm:$0xf0] }
 0x12e   :  { %v3076_v2 = vor.u32 %v3413_v57, %v3073_v58  ;;  %v3364_v50 = vld [vmem:[#allocation9 + $0x2ac] sm:$0xf]  ;;  %v2877_v51 = vld [vmem:[#allocation9 + $0x2c4] sm:$0xf0]  ;;  %v2717_v57 = vld [vmem:[#allocation9 + $0x17c] sm:$0xf0] }
 0x12f   :  { %v2880_v58 = vor.u32 %v3364_v50, %v2877_v51 }
 0x134   :  { %v713_v39 = vpop.f32.mrf.mxu3  ;;  %v752_v5 = vpop.f32.mrf.mxu2 }
 0x135   :  { %v739_v7 = vpop.f32.mrf.mxu1  ;;  %v3409_v39 = vld [vmem:[#allocation9 + $0x410] sm:$0xf0] }
 0x136   :  { %v724_v8 = vpop.f32.mrf.mxu0  ;;  %v3385_v5 = vld [vmem:[#allocation9 + $0x354] sm:$0xf]  ;;  %v3044_v14 = vor.u32 %v3409_v39, %v3043_v3  ;;  %v3319_v3 = vld [vmem:[#allocation9 + $0x140] sm:$0xf0]  ;;  %v3316_v39 = vld [vmem:[#allocation9 + $0x12c] sm:$0xf] }
 0x137   :  { %v725_v9 = vadd.f32 %v724_v8, %v712_v6  ;;  %v2961_v6 = vld [vmem:[#allocation9 + $0x36c] sm:$0xf0] }
 0x139   :  { %v738_v11 = vadd.f32 %v737_v62, %v725_v9  ;;  %v3322_v62 = vld [vmem:[#allocation9 + $0x15c] sm:$0xf] }
 0x13a   :  { %v2712_v8 = vor.u32 %v3322_v62, %v2709_v63  ;;  %v3406_v9 = vld [vmem:[#allocation9 + $0x3fc] sm:$0xf]  ;;  %v3357_v63 = vld [vmem:[#allocation9 + $0x274] sm:$0xf] }
 0x13b   :  { %v819_v15 = vmax.f32 %v738_v11, 0.0 }
 0x13c   :  { %v763_v16 = vpop.f32.mrf.mxu3 }
 0x13d   :  { %v3712_v20 = vpack.c.bf16 %v819_v15, %v819_v15  ;;  %v789_v21 = vpop.f32.mrf.mxu1  ;;  %v802_v22 = vpop.f32.mrf.mxu2  ;;  %v764_v42 = vadd.f32 %v763_v16, %v751_v23  ;;  %v2964_v15 = vor.u32 %v3385_v5, %v2961_v6  ;;  %v3015_v16 = vld [vmem:[#allocation9 + $0x3c0] sm:$0xf]  ;;  %v3371_v23 = vld [vmem:[#allocation9 + $0x2e4] sm:$0xf]  ;;  %v2689_v5 = vld [vmem:[#allocation9 + $0x144] sm:$0xf0] }
 0x13e   :  { %v726_v27 = vpop.f32.mrf.mxu0  ;;  %v790_v48 = vadd.f32 %v789_v21, %v314_v36  ;;  %v3378_v21 = vld [vmem:[#allocation9 + $0x31c] sm:$0xf]  ;;  %v2905_v36 = vld [vmem:[#allocation9 + $0x2fc] sm:$0xf0]  ;;  %v2692_v12 = vor.u32 %v3316_v39, %v2689_v5  ;;  %v3284_v39 = vld [vmem:[#allocation9 + $0x28] sm:$0xf0] }
 0x13f   :  { %1905 = vmatmul.bf16.vlgmr.msra.gmra.mxu0 %v3712_v20  ;;  %1944 = vmatmul.bf16.vlgmr.msrb.gmra.mxu3 %v3712_v20  ;;  %v3308_v27 = vld [vmem:[#allocation9 + $0xec] sm:$0xf]  ;;  %v2908_v45 = vor.u32 %v3371_v23, %v2905_v36 }
 0x140   :  { %2001 = vmatpush.bf16.msra.mxu0 %v3184_v17  ;;  %2040 = vmatpush.bf16.msrb.mxu3 %v3188_v18  ;;  %v803_v60 = vadd.f32 %v802_v22, %v790_v48  ;;  %v3048_v18 = vor.u32 %v3406_v9, %v3045_v10  ;;  %v2933_v22 = vld [vmem:[#allocation9 + $0x334] sm:$0xf0]  ;;  %v3350_v10 = vld [vmem:[#allocation9 + $0x23c] sm:$0xf] }
 0x141   :  { %v2936_v32 = vor.u32 %v3378_v21, %v2933_v22  ;;  %v3280_v21 = vld [vmem:[#allocation9 + $0xc] sm:$0xf]  ;;  %v2541_v22 = vld [vmem:[#allocation9 + $0x24] sm:$0xf0] }
 0x142   :  { %v2544_v33 = vor.u32 %v3280_v21, %v2541_v22 }
 0x144   :  { %2002 = vmatpush.bf16.msra.mxu0 %v3156_v29  ;;  %2041 = vmatpush.bf16.msrb.mxu3 %v3160_v31  ;;  %v765_v37 = vpop.f32.mrf.mxu3  ;;  %v3016_v31 = vor.u32 %v3402_v19, %v3015_v16  ;;  %v3309_v16 = vld [vmem:[#allocation9 + $0xf4] sm:$0xf] }
 0x145   :  { %v791_v30 = vpop.f32.mrf.mxu1  ;;  %v804_v43 = vpop.f32.mrf.mxu2  ;;  %v3392_v37 = vld [vmem:[#allocation9 + $0x38c] sm:$0xf] }
 0x146   :  { %v776_v47 = vpop.f32.mrf.mxu0  ;;  %v3330_v30 = vld [vmem:[#allocation9 + $0x19c] sm:$0xf]  ;;  %v2745_v43 = vld [vmem:[#allocation9 + $0x1b4] sm:$0xf0] }
 0x147   :  { %v777_v49 = vadd.f32 %v776_v47, %v764_v42  ;;  %v3333_v42 = vld [vmem:[#allocation9 + $0x1b0] sm:$0xf0]  ;;  %v2625_v47 = vld [vmem:[#allocation9 + $0xcc] sm:$0xf0] }
 0x148   :  { %2003 = vmatpush.bf16.msra.mxu0 %v3128_v38  ;;  %2042 = vmatpush.bf16.msrb.mxu3 %v3132_v40  ;;  %v2656_v38 = vor.u32 %v3308_v27, %v2653_v28  ;;  %v2989_v40 = vld [vmem:[#allocation9 + $0x3a4] sm:$0xf0]  ;;  %v2628_v55 = vor.u32 %v3301_v46, %v2625_v47  ;;  %v3343_v27 = vld [vmem:[#allocation9 + $0x204] sm:$0xf]  ;;  %v2793_v28 = vld [vmem:[#allocation9 + $0x21c] sm:$0xf0] }
 0x149   :  { %v820_v56 = vmax.f32 %v777_v49, 0.0  ;;  %v2992_v48 = vor.u32 %v3392_v37, %v2989_v40  ;;  %v2744_v49 = vor.u32 %v3333_v42, %v2743_v41  ;;  %v2796_v36 = vor.u32 %v3343_v27, %v2793_v28  ;;  %v2939_v37 = vld [vmem:[#allocation9 + $0x320] sm:$0xf]  ;;  %v3336_v41 = vld [vmem:[#allocation9 + $0x1cc] sm:$0xf] }
 0x14a   :  { %v2765_v42 = vld [vmem:[#allocation9 + $0x1e4] sm:$0xf0]  ;;  %v3445_v46 = vld [vmem:[#allocation9 + $0x530] sm:$0xf0]  ;;  %v3295_v47 = vld [vmem:[#allocation9 + $0x84] sm:$0xf] }
 0x14b   :  { %v3716_v61 = vpack.c.bf16 %v820_v56, %v820_v56  ;;  %v3323_v56 = vld [vmem:[#allocation9 + $0x164] sm:$0xf]  ;;  %v2768_v50 = vor.u32 %v3336_v41, %v2765_v42  ;;  %v2941_v28 = vld [vmem:[#allocation9 + $0x33c] sm:$0xf0]  ;;  %v2913_v41 = vld [vmem:[#allocation9 + $0x304] sm:$0xf0] }
 0x14c   :  { %2004 = vmatpush.bf16.msra.mxu0 %v3100_v52  ;;  %2043 = vmatpush.bf16.msrb.mxu3 %v3104_v53  ;;  %v815_v0 = vpop.f32.mrf.mxu3  ;;  %v2748_v52 = vor.u32 %v3330_v30, %v2745_v43  ;;  %v2715_v53 = vld [vmem:[#allocation9 + $0x160] sm:$0xf]  ;;  %v3379_v27 = vld [vmem:[#allocation9 + $0x324] sm:$0xf] }
 0x14d   :  { %v816_v4 = vadd.f32 %v815_v0, %v803_v60  ;;  %1918 = vmatmul.bf16.vlgmr.msra.gmra.mxu1 %v3716_v61  ;;  %v2597_v60 = vld [vmem:[#allocation9 + $0x94] sm:$0xf0]  ;;  %v2716_v62 = vor.u32 %v3326_v54, %v2715_v53  ;;  %v2849_v0 = vld [vmem:[#allocation9 + $0x28c] sm:$0xf0]  ;;  %v2603_v30 = vld [vmem:[#allocation9 + $0x80] sm:$0xf] }
 0x14e   :  { %2014 = vmatpush.bf16.msra.mxu1 %v2740_v59  ;;  %v778_v7 = vpop.f32.mrf.mxu0  ;;  %v3294_v59 = vld [vmem:[#allocation9 + $0x7c] sm:$0xf]  ;;  %v2852_v6 = vor.u32 %v3357_v63, %v2849_v0  ;;  %v2911_v53 = vld [vmem:[#allocation9 + $0x2e8] sm:$0xf]  ;;  %v3375_v54 = vld [vmem:[#allocation9 + $0x300] sm:$0xf0] }
 0x14f   :  { %v821_v11 = vmax.f32 %v816_v4, 0.0  ;;  %1957 = vmatmul.bf16.vlgmr.msrb.gmra.mxu0 %v3716_v61  ;;  %1996 = vmatmul.bf16.vlgmr.msra.gmra.mxu3 %v3716_v61  ;;  %v2600_v4 = vor.u32 %v3294_v59, %v2597_v60  ;;  %v3287_v7 = vld [vmem:[#allocation9 + $0x44] sm:$0xf]  ;;  %v3438_v59 = vld [vmem:[#allocation9 + $0x4f8] sm:$0xf0]  ;;  %v2912_v63 = vor.u32 %v3375_v54, %v2911_v53 }
 0x150   :  { %2005 = vmatpush.bf16.msra.mxu0 %v3072_v1  ;;  %2044 = vmatpush.bf16.msrb.mxu3 %v3076_v2  ;;  %v2720_v1 = vor.u32 %v3323_v56, %v2717_v57  ;;  %v2687_v2 = vld [vmem:[#allocation9 + $0x128] sm:$0xf]  ;;  %v3291_v57 = vld [vmem:[#allocation9 + $0x60] sm:$0xf0]  ;;  %v3288_v60 = vld [vmem:[#allocation9 + $0x4c] sm:$0xf] }
 0x151   :  { %v3721_v17 = vpack.c.bf16 %v821_v11, %v821_v11  ;;  %v2688_v9 = vor.u32 %v3319_v3, %v2687_v2  ;;  %v2821_v11 = vld [vmem:[#allocation9 + $0x254] sm:$0xf0]  ;;  %v2883_v0 = vld [vmem:[#allocation9 + $0x2b0] sm:$0xf]  ;;  %v3368_v3 = vld [vmem:[#allocation9 + $0x2c8] sm:$0xf0] }
 0x152   :  { %2015 = vmatpush.bf16.msra.mxu1 %v2712_v8  ;;  %v2569_v8 = vld [vmem:[#allocation9 + $0x5c] sm:$0xf0]  ;;  %v2824_v19 = vor.u32 %v3350_v10, %v2821_v11  ;;  %v3386_v10 = vld [vmem:[#allocation9 + $0x35c] sm:$0xf]  ;;  %v2969_v11 = vld [vmem:[#allocation9 + $0x374] sm:$0xf0] }
 0x153   :  { %1931 = vmatmul.bf16.vlgmr.msrb.gmra.mxu2 %v3721_v17  ;;  %v2972_v22 = vor.u32 %v3386_v10, %v2969_v11  ;;  %v2891_v54 = vld [vmem:[#allocation9 + $0x2b8] sm:$0xf]  ;;  %v2995_v11 = vld [vmem:[#allocation9 + $0x390] sm:$0xf] }
 0x154   :  { %2006 = vmatpush.bf16.msra.mxu0 %v3044_v14  ;;  %2027 = vmatpush.bf16.msrb.mxu2 %v2964_v15  ;;  %v817_v29 = vpop.f32.mrf.mxu3  ;;  %v3312_v14 = vld [vmem:[#allocation9 + $0x108] sm:$0xf0]  ;;  %v2572_v15 = vor.u32 %v3287_v7, %v2569_v8  ;;  %v3431_v7 = vld [vmem:[#allocation9 + $0x4c0] sm:$0xf0]  ;;  %v3281_v8 = vld [vmem:[#allocation9 + $0x14] sm:$0xf] }
 0x155   :  { %2045 = vmatpush.bf16.msrb.mxu3 %v3048_v18  ;;  %v2661_v18 = vld [vmem:[#allocation9 + $0x10c] sm:$0xf0]  ;;  %v2660_v25 = vor.u32 %v3312_v14, %v2659_v13  ;;  %v2975_v13 = vld [vmem:[#allocation9 + $0x360] sm:$0xf]  ;;  %v3390_v14 = vld [vmem:[#allocation9 + $0x378] sm:$0xf0] }
 0x156   :  { %2016 = vmatpush.bf16.msra.mxu1 %v2684_v24  ;;  %v2967_v24 = vld [vmem:[#allocation9 + $0x358] sm:$0xf]  ;;  %v2664_v29 = vor.u32 %v3309_v16, %v2661_v18 }
 0x157   :  { %v2968_v23 = vor.u32 %v3389_v26, %v2967_v24  ;;  %v2855_v18 = vld [vmem:[#allocation9 + $0x278] sm:$0xf]  ;;  %v3107_v24 = vld [vmem:[#allocation9 + $0x470] sm:$0xf]  ;;  %v2976_v26 = vor.u32 %v3390_v14, %v2975_v13  ;;  %v3351_v13 = vld [vmem:[#allocation9 + $0x244] sm:$0xf] }
 0x158   :  { %2007 = vmatpush.bf16.msra.mxu0 %v3016_v31  ;;  %2028 = vmatpush.bf16.msrb.mxu2 %v2936_v32  ;;  %v2631_v31 = vld [vmem:[#allocation9 + $0xb8] sm:$0xf]  ;;  %v3305_v32 = vld [vmem:[#allocation9 + $0xd0] sm:$0xf0] }
 0x159   :  { %2046 = vmatpush.bf16.msrb.mxu3 %v3020_v35  ;;  %v2633_v35 = vld [vmem:[#allocation9 + $0xd4] sm:$0xf0]  ;;  %v2632_v40 = vor.u32 %v3305_v32, %v2631_v31  ;;  %v2947_v31 = vld [vmem:[#allocation9 + $0x328] sm:$0xf]  ;;  %v3383_v32 = vld [vmem:[#allocation9 + $0x340] sm:$0xf0] }
 0x15a   :  { %2017 = vmatpush.bf16.msra.mxu1 %v2656_v38  ;;  %v3382_v38 = vld [vmem:[#allocation9 + $0x338] sm:$0xf0]  ;;  %v2636_v43 = vor.u32 %v3302_v34, %v2633_v35  ;;  %v2827_v34 = vld [vmem:[#allocation9 + $0x240] sm:$0xf] }
 0x15b   :  { %v3354_v35 = vld [vmem:[#allocation9 + $0x258] sm:$0xf0] }
 0x15c   :  { %2008 = vmatpush.bf16.msra.mxu0 %v2988_v44  ;;  %2029 = vmatpush.bf16.msrb.mxu2 %v2908_v45  ;;  %v3298_v44 = vld [vmem:[#allocation9 + $0x98] sm:$0xf0]  ;;  %v3191_v45 = vld [vmem:[#allocation9 + $0x518] sm:$0xf]  ;;  %v2828_v42 = vor.u32 %v3354_v35, %v2827_v34  ;;  %v3327_v34 = vld [vmem:[#allocation9 + $0x180] sm:$0xf0] }
 0x15d   :  { %2047 = vmatpush.bf16.msrb.mxu3 %v2992_v48  ;;  %1970 = vmatmul.bf16.vlgmr.msrb.gmra.mxu1 %v3721_v17  ;;  %v2605_v48 = vld [vmem:[#allocation9 + $0x9c] sm:$0xf0]  ;;  %v2604_v51 = vor.u32 %v3298_v44, %v2603_v30  ;;  %v2919_v30 = vld [vmem:[#allocation9 + $0x2f0] sm:$0xf] }
 0x15e   :  { %2018 = vmatpush.bf16.msra.mxu1 %v2628_v55  ;;  %v2575_v55 = vld [vmem:[#allocation9 + $0x48] sm:$0xf]  ;;  %v2608_v56 = vor.u32 %v3295_v47, %v2605_v48  ;;  %v3051_v48 = vld [vmem:[#allocation9 + $0x400] sm:$0xf]  ;;  %v2807_v35 = vld [vmem:[#allocation9 + $0x210] sm:$0xf] }
 0x15f   :  { %2009 = vmatmul.bf16.vlgmr.msra.gmra.mxu0 %v3721_v17 }
 0x160   :  { %2053 = vmatpush.bf16.msrb.mxu0 %v2744_v49  ;;  %2030 = vmatpush.bf16.msrb.mxu2 %v2880_v58  ;;  %v2940_v49 = vor.u32 %v3382_v38, %v2939_v37  ;;  %v3163_v58 = vld [vmem:[#allocation9 + $0x4e0] sm:$0xf]  ;;  %v3417_v37 = vld [vmem:[#allocation9 + $0x450] sm:$0xf0]  ;;  %v2948_v38 = vor.u32 %v3383_v32, %v2947_v31  ;;  %v2801_v32 = vld [vmem:[#allocation9 + $0x224] sm:$0xf0] }
 0x161   :  { %2092 = vmatpush.bf16.msra.mxu3 %v2748_v52  ;;  %v3192_v52 = vor.u32 %v3445_v46, %v3191_v45  ;;  %v3164_v2 = vor.u32 %v3438_v59, %v3163_v58  ;;  %v2799_v45 = vld [vmem:[#allocation9 + $0x208] sm:$0xf]  ;;  %v3347_v46 = vld [vmem:[#allocation9 + $0x220] sm:$0xf0]  ;;  %v3340_v58 = vld [vmem:[#allocation9 + $0x1e8] sm:$0xf0] }
 0x162   :  { %2048 = vmatmul.bf16.vlgmr.msrb.gmra.mxu3 %v3721_v17  ;;  %2019 = vmatpush.bf16.msra.mxu1 %v2600_v4  ;;  %v2547_v4 = vld [vmem:[#allocation9 + $0x10] sm:$0xf]  ;;  %v2800_v53 = vor.u32 %v3347_v46, %v2799_v45  ;;  %v3442_v59 = vld [vmem:[#allocation9 + $0x51c] sm:$0xf]  ;;  %v3320_v45 = vld [vmem:[#allocation9 + $0x148] sm:$0xf0] }
 0x163   :  { %1983 = vmatmul.bf16.vlgmr.msra.gmra.mxu2 %v3712_v20  ;;  %v2779_v46 = vld [vmem:[#allocation9 + $0x1d8] sm:$0xf] }
 0x164   :  { %2054 = vmatpush.bf16.msrb.mxu0 %v2716_v62  ;;  %2031 = vmatpush.bf16.msrb.mxu2 %v2852_v6  ;;  %v2577_v62 = vld [vmem:[#allocation9 + $0x64] sm:$0xf0] }
 0x165   :  { %2093 = vmatpush.bf16.msra.mxu3 %v2720_v1  ;;  %v2576_v1 = vor.u32 %v3291_v57, %v2575_v55  ;;  %v2580_v5 = vor.u32 %v3288_v60, %v2577_v62  ;;  %v3135_v6 = vld [vmem:[#allocation9 + $0x4a8] sm:$0xf]  ;;  %v3369_v55 = vld [vmem:[#allocation9 + $0x2d0] sm:$0xf0]  ;;  %v2771_v57 = vld [vmem:[#allocation9 + $0x1d0] sm:$0xf] }
 0x166   :  { %2020 = vmatpush.bf16.msra.mxu1 %v2572_v15  ;;  %v2548_v15 = vor.u32 %v3284_v39, %v2547_v4  ;;  %v3136_v16 = vor.u32 %v3431_v7, %v3135_v6  ;;  %v3193_v62 = vld [vmem:[#allocation9 + $0x534] sm:$0xf0]  ;;  %v2772_v4 = vor.u32 %v3340_v58, %v2771_v57  ;;  %v2863_v39 = vld [vmem:[#allocation9 + $0x280] sm:$0xf]  ;;  %v3313_v58 = vld [vmem:[#allocation9 + $0x110] sm:$0xf0] }
 0x167   :  { %v3196_v6 = vor.u32 %v3442_v59, %v3193_v62  ;;  %v2667_v57 = vld [vmem:[#allocation9 + $0xf8] sm:$0xf]  ;;  %v3171_v59 = vld [vmem:[#allocation9 + $0x4e8] sm:$0xf] }
 0x168   :  { %2055 = vmatpush.bf16.msrb.mxu0 %v2688_v9  ;;  %2032 = vmatpush.bf16.msrb.mxu2 %v2824_v19  ;;  %v2549_v9 = vld [vmem:[#allocation9 + $0x2c] sm:$0xf0]  ;;  %v3361_v19 = vld [vmem:[#allocation9 + $0x290] sm:$0xf0] }
 0x169   :  { %2094 = vmatpush.bf16.msra.mxu3 %v2692_v12  ;;  %v2884_v12 = vor.u32 %v3368_v3, %v2883_v0  ;;  %v2552_v21 = vor.u32 %v3281_v8, %v2549_v9  ;;  %v3403_v0 = vld [vmem:[#allocation9 + $0x3e0] sm:$0xf0]  ;;  %v2857_v3 = vld [vmem:[#allocation9 + $0x294] sm:$0xf0]  ;;  %v3165_v9 = vld [vmem:[#allocation9 + $0x4fc] sm:$0xf0] }
 0x16a   :  { %2021 = vmatpush.bf16.msra.mxu1 %v2544_v33  ;;  %v3435_v8 = vld [vmem:[#allocation9 + $0x4e4] sm:$0xf] }
 0x16c   :  { %2056 = vmatpush.bf16.msrb.mxu0 %v2660_v25  ;;  %2033 = vmatpush.bf16.msrb.mxu2 %v2796_v36  ;;  %v3424_v25 = vld [vmem:[#allocation9 + $0x488] sm:$0xf0]  ;;  %v3079_v36 = vld [vmem:[#allocation9 + $0x438] sm:$0xf] }
 0x16d   :  { %2095 = vmatpush.bf16.msra.mxu3 %v2664_v29  ;;  %2022 = vmatmul.bf16.vlgmr.msra.gmra.mxu1 %v3712_v20  ;;  %v2856_v29 = vor.u32 %v3361_v19, %v2855_v18  ;;  %v3108_v33 = vor.u32 %v3424_v25, %v3107_v24  ;;  %v3080_v44 = vor.u32 %v3417_v37, %v3079_v36  ;;  %v3334_v18 = vld [vmem:[#allocation9 + $0x1b8] sm:$0xf0]  ;;  %v2835_v19 = vld [vmem:[#allocation9 + $0x248] sm:$0xf]  ;;  %v3421_v37 = vld [vmem:[#allocation9 + $0x474] sm:$0xf] }
 0x16e   :  { %2066 = vmatpush.bf16.msrb.mxu1 %v2968_v23  ;;  %v2944_v23 = vor.u32 %v3379_v27, %v2941_v28  ;;  %v3428_v27 = vld [vmem:[#allocation9 + $0x4ac] sm:$0xf]  ;;  %v3137_v28 = vld [vmem:[#allocation9 + $0x4c4] sm:$0xf0] }
 0x16f   :  { %v3140_v36 = vor.u32 %v3428_v27, %v3137_v28 }
 0x170   :  { %2057 = vmatpush.bf16.msrb.mxu0 %v2632_v40  ;;  %2034 = vmatpush.bf16.msrb.mxu2 %v2768_v50  ;;  %v3372_v40 = vld [vmem:[#allocation9 + $0x2ec] sm:$0xf] }
 0x171   :  { %2096 = vmatpush.bf16.msra.mxu3 %v2636_v43  ;;  %v3376_v43 = vld [vmem:[#allocation9 + $0x308] sm:$0xf0]  ;;  %v2916_v47 = vor.u32 %v3372_v40, %v2913_v41  ;;  %v3109_v41 = vld [vmem:[#allocation9 + $0x48c] sm:$0xf0] }
 0x172   :  { %2067 = vmatpush.bf16.msrb.mxu1 %v2940_v49  ;;  %v3410_v49 = vld [vmem:[#allocation9 + $0x418] sm:$0xf0]  ;;  %v2920_v50 = vor.u32 %v3376_v43, %v2919_v30  ;;  %v2773_v30 = vld [vmem:[#allocation9 + $0x1ec] sm:$0xf0] }
 0x173   :  { %2035 = vmatmul.bf16.vlgmr.msrb.gmra.mxu2 %v3716_v61 }
 0x174   :  { %2058 = vmatpush.bf16.msrb.mxu0 %v2604_v51  ;;  %2079 = vmatpush.bf16.msra.mxu2 %v3192_v52  ;;  %v3365_v51 = vld [vmem:[#allocation9 + $0x2b4] sm:$0xf]  ;;  %v2885_v52 = vld [vmem:[#allocation9 + $0x2cc] sm:$0xf0] }
 0x175   :  { %2097 = vmatpush.bf16.msra.mxu3 %v2608_v56  ;;  %v3052_v56 = vor.u32 %v3410_v49, %v3051_v48  ;;  %v2888_v60 = vor.u32 %v3365_v51, %v2885_v52  ;;  %v3199_v48 = vld [vmem:[#allocation9 + $0x520] sm:$0xf]  ;;  %v3446_v49 = vld [vmem:[#allocation9 + $0x538] sm:$0xf0] }
 0x176   :  { %2068 = vmatpush.bf16.msrb.mxu1 %v2912_v63  ;;  %v3023_v63 = vld [vmem:[#allocation9 + $0x3c8] sm:$0xf] }
 0x177   :  { %v3024_v7 = vor.u32 %v3403_v0, %v3023_v63  ;;  %v2668_v63 = vor.u32 %v3313_v58, %v2667_v57  ;;  %v3407_v0 = vld [vmem:[#allocation9 + $0x404] sm:$0xf] }
 0x178   :  { %2059 = vmatpush.bf16.msrb.mxu0 %v2576_v1  ;;  %2080 = vmatpush.bf16.msra.mxu2 %v3164_v2  ;;  %v2892_v1 = vor.u32 %v3369_v55, %v2891_v54  ;;  %v3358_v2 = vld [vmem:[#allocation9 + $0x27c] sm:$0xf]  ;;  %v3081_v54 = vld [vmem:[#allocation9 + $0x454] sm:$0xf0] }
 0x179   :  { %2098 = vmatpush.bf16.msra.mxu3 %v2580_v5  ;;  %v3362_v5 = vld [vmem:[#allocation9 + $0x298] sm:$0xf0]  ;;  %v2860_v10 = vor.u32 %v3358_v2, %v2857_v3  ;;  %v2639_v3 = vld [vmem:[#allocation9 + $0xc0] sm:$0xf] }
 0x17a   :  { %2069 = vmatpush.bf16.msrb.mxu1 %v2884_v12  ;;  %v3396_v12 = vld [vmem:[#allocation9 + $0x3a8] sm:$0xf0]  ;;  %v2864_v14 = vor.u32 %v3362_v5, %v2863_v39  ;;  %v3143_v39 = vld [vmem:[#allocation9 + $0x4b0] sm:$0xf] }
 0x17b   :  { %v2996_v24 = vor.u32 %v3396_v12, %v2995_v11  ;;  %v3432_v5 = vld [vmem:[#allocation9 + $0x4c8] sm:$0xf0]  ;;  %v2611_v11 = vld [vmem:[#allocation9 + $0x88] sm:$0xf]  ;;  %v3299_v12 = vld [vmem:[#allocation9 + $0xa0] sm:$0xf0] }
 0x17c   :  { %2060 = vmatpush.bf16.msrb.mxu0 %v2548_v15  ;;  %2081 = vmatpush.bf16.msra.mxu2 %v3136_v16  ;;  %v2829_v15 = vld [vmem:[#allocation9 + $0x25c] sm:$0xf0] }
 0x17d   :  { %2099 = vmatpush.bf16.msra.mxu3 %v2552_v21  ;;  %v2751_v16 = vld [vmem:[#allocation9 + $0x1a0] sm:$0xf]  ;;  %v3355_v21 = vld [vmem:[#allocation9 + $0x260] sm:$0xf0]  ;;  %v2832_v25 = vor.u32 %v3351_v13, %v2829_v15  ;;  %v3115_v13 = vld [vmem:[#allocation9 + $0x478] sm:$0xf] }
 0x17e   :  { %2070 = vmatpush.bf16.msrb.mxu1 %v2856_v29  ;;  %v3344_v29 = vld [vmem:[#allocation9 + $0x20c] sm:$0xf]  ;;  %v2836_v31 = vor.u32 %v3355_v21, %v2835_v19  ;;  %v2997_v19 = vld [vmem:[#allocation9 + $0x3ac] sm:$0xf0] }
 0x17f   :  { %2061 = vmatmul.bf16.vlgmr.msrb.gmra.mxu0 %v3712_v20 }
 0x180   :  { %2105 = vmatpush.bf16.msra.mxu0 %v2972_v22  ;;  %2100 = vmatmul.bf16.vlgmr.msra.gmra.mxu3 %v3712_v20  ;;  %v3168_v22 = vor.u32 %v3435_v8, %v3165_v9  ;;  %v3400_v8 = vld [vmem:[#allocation9 + $0x3cc] sm:$0xf]  ;;  %v3025_v9 = vld [vmem:[#allocation9 + $0x3e4] sm:$0xf0] }
 0x181   :  { %2144 = vmatpush.bf16.msrb.mxu3 %v2976_v26  ;;  %2082 = vmatpush.bf16.msra.mxu2 %v3108_v33  ;;  %v2752_v26 = vor.u32 %v3334_v18, %v2751_v16  ;;  %v2723_v33 = vld [vmem:[#allocation9 + $0x168] sm:$0xf]  ;;  %v3028_v15 = vor.u32 %v3400_v8, %v3025_v9  ;;  %v2612_v16 = vor.u32 %v3299_v12, %v2611_v11  ;;  %v3393_v18 = vld [vmem:[#allocation9 + $0x394] sm:$0xf] }
 0x182   :  { %2071 = vmatpush.bf16.msrb.mxu1 %v2828_v42  ;;  %v2724_v40 = vor.u32 %v3327_v34, %v2723_v33  ;;  %v3337_v42 = vld [vmem:[#allocation9 + $0x1d4] sm:$0xf]  ;;  %v3411_v33 = vld [vmem:[#allocation9 + $0x420] sm:$0xf0] }
 0x183   :  { %v2776_v51 = vor.u32 %v3337_v42, %v2773_v30 }
 0x184   :  { %2106 = vmatpush.bf16.msra.mxu0 %v2944_v23  ;;  %v3348_v23 = vld [vmem:[#allocation9 + $0x228] sm:$0xf0] }
 0x185   :  { %2145 = vmatpush.bf16.msrb.mxu3 %v2948_v38  ;;  %2083 = vmatpush.bf16.msra.mxu2 %v3080_v44  ;;  %v2804_v38 = vor.u32 %v3344_v29, %v2801_v32  ;;  %v2808_v43 = vor.u32 %v3348_v23, %v2807_v35  ;;  %v2695_v44 = vld [vmem:[#allocation9 + $0x130] sm:$0xf]  ;;  %v2555_v29 = vld [vmem:[#allocation9 + $0x18] sm:$0xf]  ;;  %v3059_v32 = vld [vmem:[#allocation9 + $0x408] sm:$0xf] }
 0x186   :  { %2072 = vmatpush.bf16.msrb.mxu1 %v2800_v53  ;;  %v2696_v52 = vor.u32 %v3320_v45, %v2695_v44  ;;  %v3414_v53 = vld [vmem:[#allocation9 + $0x43c] sm:$0xf]  ;;  %v3060_v35 = vor.u32 %v3411_v33, %v3059_v32  ;;  %v3031_v23 = vld [vmem:[#allocation9 + $0x3d0] sm:$0xf] }
 0x187   :  { %v3084_v62 = vor.u32 %v3414_v53, %v3081_v54 }
 0x188   :  { %2107 = vmatpush.bf16.msra.mxu0 %v2916_v47  ;;  %v3341_v47 = vld [vmem:[#allocation9 + $0x1f0] sm:$0xf0] }
 0x189   :  { %2146 = vmatpush.bf16.msrb.mxu3 %v2920_v50  ;;  %2084 = vmatpush.bf16.msra.mxu2 %v3052_v56  ;;  %v3112_v50 = vor.u32 %v3421_v37, %v3109_v41  ;;  %v2780_v55 = vor.u32 %v3341_v47, %v2779_v46  ;;  %v3200_v56 = vor.u32 %v3446_v49, %v3199_v48  ;;  %v3739_v46 = vld [vmem:[#allocation10] sm:$0xff] }
 0x18a   :  { %2073 = vmatpush.bf16.msrb.mxu1 %v2772_v4  ;;  %v3306_v4 = vld [vmem:[#allocation9 + $0xd8] sm:$0xf0]  ;;  %v1019_v48 = vperm.slane %v3739_v46, 0 }
 0x18c   :  { %2108 = vmatpush.bf16.msra.mxu0 %v2888_v60  ;;  %v3439_v60 = vld [vmem:[#allocation9 + $0x500] sm:$0xf0] }
 0x18d   :  { %2147 = vmatpush.bf16.msrb.mxu3 %v2892_v1  ;;  %2085 = vmatpush.bf16.msra.mxu2 %v3024_v7  ;;  %v3053_v1 = vld [vmem:[#allocation9 + $0x41c] sm:$0xf0]  ;;  %v3172_v2 = vor.u32 %v3439_v60, %v3171_v59  ;;  %v2640_v7 = vor.u32 %v3306_v4, %v2639_v3 }
 0x18e   :  { %2118 = vmatpush.bf16.msra.mxu1 %v3196_v6  ;;  %v3056_v6 = vor.u32 %v3407_v0, %v3053_v1 }
 0x18f   :  { %2074 = vmatmul.bf16.vlgmr.msrb.gmra.mxu1 %v3716_v61 }
 0x190   :  { %2109 = vmatpush.bf16.msra.mxu0 %v2860_v10  ;;  %v3144_v10 = vor.u32 %v3432_v5, %v3143_v39  ;;  %v1021_v5 = vperm.slane %v3739_v46, 2 }
 0x191   :  { %2148 = vmatpush.bf16.msrb.mxu3 %v2864_v14  ;;  %2086 = vmatpush.bf16.msra.mxu2 %v2996_v24  ;;  %v3425_v14 = vld [vmem:[#allocation9 + $0x490] sm:$0xf0]  ;;  %v3087_v24 = vld [vmem:[#allocation9 + $0x440] sm:$0xf] }
 0x192   :  { %2119 = vmatpush.bf16.msra.mxu1 %v3168_v22  ;;  %v3116_v21 = vor.u32 %v3425_v14, %v3115_v13  ;;  %v2583_v22 = vld [vmem:[#allocation9 + $0x50] sm:$0xf] }
 0x194   :  { %2110 = vmatpush.bf16.msra.mxu0 %v2832_v25  ;;  %2087 = vmatmul.bf16.vlgmr.msra.gmra.mxu2 %v3721_v17  ;;  %v3418_v25 = vld [vmem:[#allocation9 + $0x458] sm:$0xf0] }
 0x195   :  { %2131 = vmatpush.bf16.msrb.mxu2 %v2752_v26  ;;  %2149 = vmatpush.bf16.msrb.mxu3 %v2836_v31  ;;  %v3000_v26 = vor.u32 %v3393_v18, %v2997_v19  ;;  %v3088_v28 = vor.u32 %v3418_v25, %v3087_v24  ;;  %v3285_v31 = vld [vmem:[#allocation9 + $0x30] sm:$0xf0]  ;;  %v1022_v19 = vperm.slane %v3739_v46, 3 }
 0x196   :  { %2120 = vmatpush.bf16.msra.mxu1 %v3140_v36  ;;  %v2556_v34 = vor.u32 %v3285_v31, %v2555_v29  ;;  %v3404_v36 = vld [vmem:[#allocation9 + $0x3e8] sm:$0xf0] }
 0x197   :  { %v3032_v37 = vor.u32 %v3404_v36, %v3031_v23 }
 0x198   :  { %2111 = vmatpush.bf16.msra.mxu0 %v2804_v38  ;;  %v3003_v38 = vld [vmem:[#allocation9 + $0x398] sm:$0xf] }
 0x199   :  { %2132 = vmatpush.bf16.msrb.mxu2 %v2724_v40  ;;  %2150 = vmatpush.bf16.msrb.mxu3 %v2808_v43  ;;  %v3397_v40 = vld [vmem:[#allocation9 + $0x3b0] sm:$0xf0] }
 0x19a   :  { %2121 = vmatpush.bf16.msra.mxu1 %v3112_v50  ;;  %v3004_v41 = vor.u32 %v3397_v40, %v3003_v38 }
 0x19c   :  { %2112 = vmatpush.bf16.msra.mxu0 %v2776_v51 }
 0x19d   :  { %2133 = vmatpush.bf16.msrb.mxu2 %v2696_v52  ;;  %2151 = vmatpush.bf16.msrb.mxu3 %v2780_v55 }
 0x19e   :  { %2122 = vmatpush.bf16.msra.mxu1 %v3084_v62 }
 0x19f   :  { %2113 = vmatmul.bf16.vlgmr.msra.gmra.mxu0 %v3716_v61 }
 0x1a0   :  { %2157 = vmatpush.bf16.msrb.mxu0 %v3200_v56  ;;  %2152 = vmatmul.bf16.vlgmr.msrb.gmra.mxu3 %v3716_v61  ;;  %v3292_v61 = vld [vmem:[#allocation9 + $0x68] sm:$0xf0] }
 0x1a1   :  { %2134 = vmatpush.bf16.msrb.mxu2 %v2668_v63  ;;  %v2584_v27 = vor.u32 %v3292_v61, %v2583_v22 }
 0x1a2   :  { %2123 = vmatpush.bf16.msra.mxu1 %v3056_v6 }
 0x1a4   :  { %2158 = vmatpush.bf16.msrb.mxu0 %v3172_v2 }
 0x1a5   :  { %2135 = vmatpush.bf16.msrb.mxu2 %v2640_v7 }
 0x1a6   :  { %2124 = vmatpush.bf16.msra.mxu1 %v3028_v15 }
 0x1a8   :  { %2159 = vmatpush.bf16.msrb.mxu0 %v3144_v10 }
 0x1a9   :  { %2136 = vmatpush.bf16.msrb.mxu2 %v2612_v16 }
 0x1aa   :  { %2125 = vmatpush.bf16.msra.mxu1 %v3000_v26 }
 0x1ac   :  { %2160 = vmatpush.bf16.msrb.mxu0 %v3116_v21 }
 0x1ad   :  { %2137 = vmatpush.bf16.msrb.mxu2 %v2584_v27  ;;  %2126 = vmatmul.bf16.vlgmr.msra.gmra.mxu1 %v3721_v17 }
 0x1b0   :  { %2161 = vmatpush.bf16.msrb.mxu0 %v3088_v28 }
 0x1b1   :  { %2138 = vmatpush.bf16.msrb.mxu2 %v2556_v34 }
 0x1b4   :  { %2162 = vmatpush.bf16.msrb.mxu0 %v3060_v35  ;;  %2139 = vmatmul.bf16.vlgmr.msrb.gmra.mxu2 %v3712_v20  ;;  %v1020_v20 = vperm.slane %v3739_v46, 1 }
 0x1b8   :  { %2163 = vmatpush.bf16.msrb.mxu0 %v3032_v37 }
 0x1bc   :  { %2164 = vmatpush.bf16.msrb.mxu0 %v3004_v41  ;;  %v1906_v42 = vpop.f32.mrf.mxu0 }
 0x1bd   :  { %v1907_v51 = vadd.f32 %v1906_v42, %v1019_v48 }
 0x1bf   :  { %2165 = vmatmul.bf16.vlgmr.msrb.gmra.mxu0 %v3721_v17 }
 0x1c2   :  { %v1945_v30 = vpop.f32.mrf.mxu3 }
 0x1c3   :  { %v1946_v17 = vadd.f32 %v1945_v30, %v1020_v20 }
 0x1c4   :  { %v1908_v43 = vpop.f32.mrf.mxu0 }
 0x1c5   :  { %v1023_v43 = vperm.slane %v3739_v46, 4 }
 0x1ca   :  { %v1919_v44 = vpop.f32.mrf.mxu1  ;;  %v1947_v45 = vpop.f32.mrf.mxu3 }
 0x1cb   :  { %v1920_v53 = vadd.f32 %v1919_v44, %v1907_v51 }
 0x1cc   :  { %v1958_v47 = vpop.f32.mrf.mxu0 }
 0x1cd   :  { %v1959_v57 = vadd.f32 %v1958_v47, %v1946_v17 }
 0x1d2   :  { %v1921_v49 = vpop.f32.mrf.mxu1  ;;  %v1997_v50 = vpop.f32.mrf.mxu3 }
 0x1d4   :  { %v1960_v52 = vpop.f32.mrf.mxu0 }
 0x1d6   :  { %v1932_v54 = vpop.f32.mrf.mxu2 }
 0x1d7   :  { %v1933_v55 = vadd.f32 %v1932_v54, %v1920_v53 }
 0x1d9   :  { %v2170_v56 = vmul.f32 0.5, %v1933_v55 }
 0x1da   :  { %v1999_v58 = vpop.f32.mrf.mxu3  ;;  %v1971_v59 = vpop.f32.mrf.mxu1 }
 0x1db   :  { %3457 = vtanh.f32 %v2170_v56  ;;  %v1972_v60 = vadd.f32 %v1971_v59, %v1959_v57 }
 0x1dc   :  { %v2010_v62 = vpop.f32.mrf.mxu0 }
 0x1dd   :  { %v2171_v63 = vmul.f32 0.5, %v1972_v60  ;;  %v1025_v60 = vperm.slane %v3739_v46, 6 }
 0x1de   :  { %v1934_v0 = vpop.f32.mrf.mxu2 }
 0x1df   :  { %3459 = vtanh.f32 %v2171_v63 }
 0x1e1   :  { %v3458_v1 = vpop.eup %3457 }
 0x1e2   :  { %v1973_v2 = vpop.f32.mrf.mxu1  ;;  %v2184_v39 = vadd.f32 1.0, %v3458_v1 }
 0x1e4   :  { %v2012_v4 = vpop.f32.mrf.mxu0  ;;  %v2191_v9 = vmul.f32 0.5, %v2184_v39 }
 0x1e5   :  { %v2049_v3 = vpop.f32.mrf.mxu3  ;;  %v3460_v6 = vpop.eup %3459 }
 0x1e6   :  { %v1984_v7 = vpop.f32.mrf.mxu2  ;;  %v2185_v8 = vadd.f32 1.0, %v3460_v6 }
 0x1e7   :  { %v1985_v11 = vadd.f32 %v1984_v7, %v1021_v5 }
 0x1e8   :  { %v2192_v10 = vmul.f32 0.5, %v2185_v8 }
 0x1e9   :  { %v1998_v15 = vadd.f32 %v1997_v50, %v1985_v11  ;;  %v1024_v50 = vperm.slane %v3739_v46, 5 }
 0x1ea   :  { %v2198_v12 = vpack.c.bf16 %v2192_v10, %v2191_v9  ;;  %v2023_v13 = vpop.f32.mrf.mxu1 }
 0x1eb   :  { %v2011_v18 = vadd.f32 %v2010_v62, %v1998_v15  ;;  %v2024_v61 = vadd.f32 %v2023_v13, %v1022_v19 }
 0x1ec   :  { %2202 = vst [vmem:[%s3767_s7] sm:$0xff] %v2198_v12 }
 0x1ed   :  { %v2051_v14 = vpop.f32.mrf.mxu3  ;;  %v2172_v22 = vmul.f32 0.5, %v2011_v18 }
 0x1ee   :  { %v1986_v16 = vpop.f32.mrf.mxu2 }
 0x1ef   :  { %3461 = vtanh.f32 %v2172_v22 }
 0x1f2   :  { %v2025_v21 = vpop.f32.mrf.mxu1 }
 0x1f5   :  { %v3462_v31 = vpop.eup %3461 }
 0x1f6   :  { %v2036_v24 = vpop.f32.mrf.mxu2  ;;  %v2186_v34 = vadd.f32 1.0, %v3462_v31 }
 0x1f7   :  { %v2037_v25 = vadd.f32 %v2036_v24, %v2024_v61 }
 0x1f8   :  { %v2193_v36 = vmul.f32 0.5, %v2186_v34 }
 0x1f9   :  { %v2050_v26 = vadd.f32 %v2049_v3, %v2037_v25 }
 0x1fb   :  { %v2173_v28 = vmul.f32 0.5, %v2050_v26 }
 0x1fc   :  { %v2062_v27 = vpop.f32.mrf.mxu0 }
 0x1fd   :  { %3463 = vtanh.f32 %v2173_v28  ;;  %v2063_v45 = vadd.f32 %v2062_v27, %v1023_v43 }
 0x1fe   :  { %v2038_v29 = vpop.f32.mrf.mxu2 }
 0x203   :  { %v2101_v32 = vpop.f32.mrf.mxu3  ;;  %v3464_v35 = vpop.eup %3463 }
 0x204   :  { %v2064_v33 = vpop.f32.mrf.mxu0  ;;  %v2187_v23 = vadd.f32 1.0, %v3464_v35  ;;  %v2102_v52 = vadd.f32 %v2101_v32, %v1024_v50 }
 0x206   :  { %v2194_v37 = vmul.f32 0.5, %v2187_v23 }
 0x208   :  { %v2199_v38 = vpack.c.bf16 %v2194_v37, %v2193_v36 }
 0x20a   :  { %2203 = vst [vmem:[%s3767_s7 + $0x8] sm:$0xff] %v2199_v38 }
 0x20b   :  { %v2103_v41 = vpop.f32.mrf.mxu3 }
 0x20c   :  { %v2075_v40 = vpop.f32.mrf.mxu1 }
 0x20d   :  { %v2076_v48 = vadd.f32 %v2075_v40, %v2063_v45 }
 0x214   :  { %v2077_v42 = vpop.f32.mrf.mxu1 }
 0x217   :  { %v2088_v30 = vpop.f32.mrf.mxu2 }
 0x218   :  { %v2089_v51 = vadd.f32 %v2088_v30, %v2076_v48 }
 0x21a   :  { %v2174_v53 = vmul.f32 0.5, %v2089_v51 }
 0x21c   :  { %v2114_v44 = vpop.f32.mrf.mxu0  ;;  %3465 = vtanh.f32 %v2174_v53 }
 0x21d   :  { %v2115_v54 = vadd.f32 %v2114_v44, %v2102_v52 }
 0x21f   :  { %v2090_v47 = vpop.f32.mrf.mxu2 }
 0x222   :  { %v3466_v58 = vpop.eup %3465 }
 0x223   :  { %v2153_v49 = vpop.f32.mrf.mxu3  ;;  %v2188_v62 = vadd.f32 1.0, %v3466_v58 }
 0x224   :  { %v2116_v20 = vpop.f32.mrf.mxu0 }
 0x225   :  { %v2195_v3 = vmul.f32 0.5, %v2188_v62 }
 0x22a   :  { %v2127_v55 = vpop.f32.mrf.mxu1 }
 0x22b   :  { %v2155_v17 = vpop.f32.mrf.mxu3  ;;  %v2128_v56 = vadd.f32 %v2127_v55, %v2115_v54 }
 0x22d   :  { %v2175_v57 = vmul.f32 0.5, %v2128_v56 }
 0x22f   :  { %3467 = vtanh.f32 %v2175_v57 }
 0x232   :  { %v2129_v59 = vpop.f32.mrf.mxu1 }
 0x235   :  { %v3468_v63 = vpop.eup %3467 }
 0x236   :  { %v2189_v1 = vadd.f32 1.0, %v3468_v63 }
 0x237   :  { %v2140_v0 = vpop.f32.mrf.mxu2 }
 0x238   :  { %v2141_v2 = vadd.f32 %v2140_v0, %v1025_v60  ;;  %v2196_v4 = vmul.f32 0.5, %v2189_v1 }
 0x23a   :  { %v2154_v39 = vadd.f32 %v2153_v49, %v2141_v2  ;;  %v2200_v6 = vpack.c.bf16 %v2196_v4, %v2195_v3 }
 0x23c   :  { %v2166_v5 = vpop.f32.mrf.mxu0  ;;  %2204 = vst [vmem:[%s3767_s7 + $0x10] sm:$0xff] %v2200_v6 }
 0x23d   :  { %v2167_v7 = vadd.f32 %v2166_v5, %v2154_v39 }
 0x23f   :  { %v2176_v8 = vmul.f32 0.5, %v2167_v7  ;;  %v2142_v9 = vpop.f32.mrf.mxu2 }
 0x241   :  { %3469 = vtanh.f32 %v2176_v8 }
 0x244   :  { %v2168_v10 = vpop.f32.mrf.mxu0 }
 0x247   :  { %v3470_v46 = vpop.eup %3469 }
 0x248   :  { %v2190_v11 = vadd.f32 1.0, %v3470_v46 }
 0x24a   :  { %v2197_v12 = vmul.f32 0.5, %v2190_v11 }
 0x24c   :  { %v2201_v13 = vpack.c.bf16 %v2197_v12, %v2197_v12 }
 0x24e   :  { %2205 = vst [vmem:[%s3767_s7 + $0x18] sm:$0xf] %v2201_v13 }
 0x24f   :  { %2210 = vsyncpa [#allocation3], 1 }
 0x250   :  { %2211 = vsyncpa [#allocation5], 1 }
 0x251   :  { %2212 = vsyncpa [#allocation8], 1 }
 0x252   :  { %2213 = vsyncpa [#allocation11], 1 }

</bundles_post_ra>
